<compile_context>
chip_gen: v5e
topology: v5e:2x2
jax: 0.10.0
libtpu: 0.0.40
codegen_flags: <defaults>
</compile_context>

<pallas_src>
import jax
import jax.numpy as jnp
import numpy as np
from jax.experimental import pallas as pl
from jax.experimental.pallas import tpu as pltpu

VOCAB = 256
D_MODEL = 128
KSIZE = 5
NUM_LAYERS = 4
BN_EPS = 1e-5


# ---------------------------------------------------------------------------
# Fused Pallas kernel: embedding + 4x(conv+BN+ReLU) + mean + linear
# ---------------------------------------------------------------------------
def fused_cnn_kernel(tok_ref, emb_ref, w_ref, b_ref, hw_ref, hb_ref, o_ref):
    """Whole forward pass in one kernel body.

    tok_ref: (B*L, 1) int32   token ids, batch-major flattened
    emb_ref: (VOCAB, D)       embedding table
    w_ref:   (NUM_LAYERS, K*D, D)  conv weights, im2col layout, BN folded in
    b_ref:   (NUM_LAYERS, D)       conv bias with BN folded in
    hw_ref:  (1, D)           classifier weight row, 1/L_final mean folded in
    hb_ref:  (1, 1)           classifier bias
    o_ref:   (B, 1)           output logits
    """
    B = o_ref.shape[0]
    BL = tok_ref.shape[0]
    L = BL // B
    V, D = emb_ref.shape
    n_layers = w_ref.shape[0]
    K = w_ref.shape[1] // D

    # ---- Embedding lookup as one-hot @ table (exact, one MXU matmul) -------
    tok = tok_ref[...]                                          # (B*L, 1) i32
    lane_ids = jax.lax.broadcasted_iota(jnp.int32, (BL, V), 1)  # (B*L, V)
    onehot = (lane_ids == tok).astype(jnp.float32)              # (B*L, V)
    x = jnp.dot(onehot, emb_ref[...],
                preferred_element_type=jnp.float32)             # (B*L, D)

    # ---- NUM_LAYERS x [Conv1d(valid) + folded BN + ReLU], im2col per layer -
    L_cur = L
    for layer in range(n_layers):                               # static unroll
        L_out = L_cur - K + 1
        pieces = []
        for bi in range(B):                                     # static unroll
            base = bi * L_cur
            taps = [x[base + k: base + k + L_out, :] for k in range(K)]
            pieces.append(jnp.concatenate(taps, axis=-1))       # (L_out, K*D)
        x_unf = jnp.concatenate(pieces, axis=0)                 # (B*L_out, K*D)
        y = jnp.dot(x_unf, w_ref[layer],
                    preferred_element_type=jnp.float32) + b_ref[layer]
        x = jnp.maximum(y, 0.0)
        L_cur = L_out

    # ---- Head: time-mean (folded into hw) + Linear(D,1) as VPU mul+reduce --
    sums = [jnp.sum(x[bi * L_cur:(bi + 1) * L_cur, :], axis=0, keepdims=True)
            for bi in range(B)]
    feat = jnp.concatenate(sums, axis=0)                        # (B, D)
    logits = jnp.sum(feat * hw_ref[...], axis=-1, keepdims=True) + hb_ref[...]
    o_ref[...] = logits.astype(o_ref.dtype)


def fused_forward(tok_col, emb, w_all, b_all, head_w, head_b, *, B):
    """Single pallas_call wrapper; everything resident in VMEM, grid=(1,)."""
    return pl.pallas_call(
        fused_cnn_kernel,
        out_shape=jax.ShapeDtypeStruct((B, 1), jnp.float32),
        grid_spec=pltpu.PrefetchScalarGridSpec(
            num_scalar_prefetch=0,
            grid=(1,),
            in_specs=[
                pl.BlockSpec(tok_col.shape, lambda i: (0, 0)),
                pl.BlockSpec(emb.shape, lambda i: (0, 0)),
                pl.BlockSpec(w_all.shape, lambda i: (0, 0, 0)),
                pl.BlockSpec(b_all.shape, lambda i: (0, 0)),
                pl.BlockSpec(head_w.shape, lambda i: (0, 0)),
                pl.BlockSpec(head_b.shape, lambda i: (0, 0)),
            ],
            out_specs=pl.BlockSpec((B, 1), lambda i: (0, 0)),
        ),
        compiler_params=pltpu.CompilerParams(
            dimension_semantics=("arbitrary",)),
    )(tok_col, emb, w_all, b_all, head_w, head_b)


# ---------------------------------------------------------------------------
# Parameters (deterministic synthetic init, PyTorch-like)
# ---------------------------------------------------------------------------
def init_params(key):
    keys = jax.random.split(key, 2 + NUM_LAYERS)
    params = {
        "embedding": jax.random.normal(keys[0], (VOCAB, D_MODEL), jnp.float32),
        "layers": [],
    }
    lim = 1.0 / np.sqrt(D_MODEL * KSIZE)
    for l in range(NUM_LAYERS):
        k = jax.random.split(keys[1 + l], 7)
        layer = {
            # stored as (K, D_in, D_out) == torch (D_out, D_in, K) transposed
            "w": jax.random.uniform(k[0], (KSIZE, D_MODEL, D_MODEL),
                                    jnp.float32, -lim, lim),
            "b": jax.random.uniform(k[1], (D_MODEL,), jnp.float32, -lim, lim),
            "gamma": jax.random.uniform(k[2], (D_MODEL,), jnp.float32, 0.5, 1.5),
            "beta": 0.1 * jax.random.normal(k[3], (D_MODEL,), jnp.float32),
            "running_mean": 0.1 * jax.random.normal(k[4], (D_MODEL,), jnp.float32),
            "running_var": jax.random.uniform(k[5], (D_MODEL,), jnp.float32,
                                              0.5, 1.5),
        }
        params["layers"].append(layer)
    kc = jax.random.split(keys[-1], 2)
    lim_c = 1.0 / np.sqrt(D_MODEL)
    params["cls_w"] = jax.random.uniform(kc[0], (D_MODEL, 1), jnp.float32,
                                         -lim_c, lim_c)
    params["cls_b"] = jax.random.uniform(kc[1], (1, 1), jnp.float32,
                                         -lim_c, lim_c)
    return params


# ---------------------------------------------------------------------------
# Model forward (fused Pallas) and pure-JAX reference
# ---------------------------------------------------------------------------
def cnn_model_forward(params, tokens):
    B, L = tokens.shape
    L_final = L - NUM_LAYERS * (KSIZE - 1)
    assert L_final >= 1, "sequence too short for 4 valid convs of kernel 5"

    # Fold conv bias + BatchNorm(eval) into im2col weights (tiny, jit-fused).
    w_list, b_list = [], []
    for layer in params["layers"]:
        scale = layer["gamma"] / jnp.sqrt(layer["running_var"] + BN_EPS)
        shift = layer["beta"] - layer["running_mean"] * scale
        w_im2col = layer["w"].reshape(KSIZE * D_MODEL, D_MODEL)   # (K*D_in, D_out)
        w_list.append(w_im2col * scale[None, :])
        b_list.append(layer["b"] * scale + shift)
    w_all = jnp.stack(w_list)                                     # (4, K*D, D)
    b_all = jnp.stack(b_list)                                     # (4, D)

    # Fold the 1/L_final time-mean into the classifier weight.
    head_w = (params["cls_w"][:, 0] / L_final)[None, :]           # (1, D)
    head_b = params["cls_b"]                                      # (1, 1)

    tok_col = tokens.reshape(B * L, 1).astype(jnp.int32)          # (B*L, 1)
    logits = fused_forward(tok_col, params["embedding"], w_all, b_all,
                           head_w, head_b, B=B)                   # (B, 1)
    return jnp.squeeze(logits, axis=-1)                           # == .squeeze()


def reference_forward(params, tokens):
    x = params["embedding"][tokens]                               # (B, L, D)
    for layer in params["layers"]:
        K = layer["w"].shape[0]
        L_out = x.shape[1] - K + 1
        acc = sum(jnp.einsum("bld,de->ble", x[:, k:k + L_out, :], layer["w"][k])
                  for k in range(K)) + layer["b"]
        scale = layer["gamma"] / jnp.sqrt(layer["running_var"] + BN_EPS)
        shift = layer["beta"] - layer["running_mean"] * scale
        x = jnp.maximum(acc * scale + shift, 0.0)
    feat = x.mean(axis=1)
    return (feat @ params["cls_w"] + params["cls_b"]).squeeze(-1)


# ---------------------------------------------------------------------------
if __name__ == "__main__":
    key = jax.random.PRNGKey(0)
    pkey, xkey = jax.random.split(key)
    params = init_params(pkey)

    B, L = 2, 24   # after 4 valid convs of k=5: 24 -> 20 -> 16 -> 12 -> 8
    tokens = jax.random.randint(xkey, (B, L), 0, VOCAB, dtype=jnp.int32)

    out = jax.jit(cnn_model_forward)(params, tokens)
    out = jax.block_until_ready(out)

    ref = reference_forward(params, tokens)
    assert out.shape == (B,), out.shape
    np.testing.assert_allclose(np.asarray(out), np.asarray(ref),
                               rtol=1e-4, atol=1e-4)
    print("KERNEL_OK")
</pallas_src>

<mosaic_0001>
module attributes {stable_mosaic.version = 11 : i64} {
  func.func @fused_cnn_kernel(%arg0: i32, %arg1: memref<48x1xi32, #tpu.memory_space<vmem>>, %arg2: memref<256x128xf32, #tpu.memory_space<vmem>>, %arg3: memref<4x640x128xf32, #tpu.memory_space<vmem>>, %arg4: memref<4x128xf32, #tpu.memory_space<vmem>>, %arg5: memref<1x128xf32, #tpu.memory_space<vmem>>, %arg6: memref<1x1xf32, #tpu.memory_space<vmem>>, %arg7: memref<2x1xf32, #tpu.memory_space<vmem>>) attributes {dimension_semantics = [#tpu.dimension_semantics<arbitrary>], iteration_bounds = array<i64: 1>, scalar_prefetch = 0 : i64, scratch_operands = 0 : i64, tpu.core_type = #tpu.core_type<tc>, window_params = [{pipeline_mode = #tpu.pipeline_mode<synchronous>, transform_indices = @transform_0, window_bounds = array<i64: 48, 1>}, {pipeline_mode = #tpu.pipeline_mode<synchronous>, transform_indices = @transform_1, window_bounds = array<i64: 256, 128>}, {pipeline_mode = #tpu.pipeline_mode<synchronous>, transform_indices = @transform_2, window_bounds = array<i64: 4, 640, 128>}, {pipeline_mode = #tpu.pipeline_mode<synchronous>, transform_indices = @transform_3, window_bounds = array<i64: 4, 128>}, {pipeline_mode = #tpu.pipeline_mode<synchronous>, transform_indices = @transform_4, window_bounds = array<i64: 1, 128>}, {pipeline_mode = #tpu.pipeline_mode<synchronous>, transform_indices = @transform_5, window_bounds = array<i64: 1, 1>}, {pipeline_mode = #tpu.pipeline_mode<synchronous>, transform_indices = @transform_6, window_bounds = array<i64: 2, 1>}]} {
    %c0 = arith.constant 0 : index
    %c0_0 = arith.constant 0 : index
    %0 = vector.load %arg1[%c0, %c0_0] : memref<48x1xi32, #tpu.memory_space<vmem>>, vector<48x1xi32>
    %1 = tpu.iota {dimensions = array<i32: 1>} : vector<48x256xi32>
    %2 = vector.broadcast %0 : vector<48x1xi32> to vector<48x256xi32>
    %3 = arith.cmpi eq, %1, %2 : vector<48x256xi32>
    %4 = arith.extui %3 : vector<48x256xi1> to vector<48x256xi32>
    %5 = arith.sitofp %4 : vector<48x256xi32> to vector<48x256xf32>
    %c0_1 = arith.constant 0 : index
    %c0_2 = arith.constant 0 : index
    %6 = vector.load %arg2[%c0_1, %c0_2] : memref<256x128xf32, #tpu.memory_space<vmem>>, vector<256x128xf32>
    %cst = arith.constant dense<0.000000e+00> : vector<48x128xf32>
    %7 = tpu.matmul %5, %6, %cst {dimension_numbers = #tpu.dot_dimension_numbers<[1], [0], [0], [1], [0, 0, 1, 1], [], []>} : vector<48x256xf32>, vector<256x128xf32>, vector<48x128xf32> -> vector<48x128xf32>
    %8 = vector.extract_strided_slice %7 {offsets = [0, 0], sizes = [20, 128], strides = [1, 1]} : vector<48x128xf32> to vector<20x128xf32>
    %9 = vector.extract_strided_slice %7 {offsets = [1, 0], sizes = [20, 128], strides = [1, 1]} : vector<48x128xf32> to vector<20x128xf32>
    %10 = vector.extract_strided_slice %7 {offsets = [2, 0], sizes = [20, 128], strides = [1, 1]} : vector<48x128xf32> to vector<20x128xf32>
    %11 = vector.extract_strided_slice %7 {offsets = [3, 0], sizes = [20, 128], strides = [1, 1]} : vector<48x128xf32> to vector<20x128xf32>
    %12 = vector.extract_strided_slice %7 {offsets = [4, 0], sizes = [20, 128], strides = [1, 1]} : vector<48x128xf32> to vector<20x128xf32>
    %13 = tpu.concatenate %8, %9, %10, %11, %12 in 1 : vector<20x128xf32>, vector<20x128xf32>, vector<20x128xf32>, vector<20x128xf32>, vector<20x128xf32> -> vector<20x640xf32>
    %14 = vector.extract_strided_slice %7 {offsets = [24, 0], sizes = [20, 128], strides = [1, 1]} : vector<48x128xf32> to vector<20x128xf32>
    %15 = vector.extract_strided_slice %7 {offsets = [25, 0], sizes = [20, 128], strides = [1, 1]} : vector<48x128xf32> to vector<20x128xf32>
    %16 = vector.extract_strided_slice %7 {offsets = [26, 0], sizes = [20, 128], strides = [1, 1]} : vector<48x128xf32> to vector<20x128xf32>
    %17 = vector.extract_strided_slice %7 {offsets = [27, 0], sizes = [20, 128], strides = [1, 1]} : vector<48x128xf32> to vector<20x128xf32>
    %18 = vector.extract_strided_slice %7 {offsets = [28, 0], sizes = [20, 128], strides = [1, 1]} : vector<48x128xf32> to vector<20x128xf32>
    %19 = tpu.concatenate %14, %15, %16, %17, %18 in 1 : vector<20x128xf32>, vector<20x128xf32>, vector<20x128xf32>, vector<20x128xf32>, vector<20x128xf32> -> vector<20x640xf32>
    %20 = tpu.concatenate %13, %19 in 0 : vector<20x640xf32>, vector<20x640xf32> -> vector<40x640xf32>
    %c0_3 = arith.constant 0 : index
    %c0_4 = arith.constant 0 : index
    %c0_5 = arith.constant 0 : index
    %21 = vector.load %arg3[%c0_3, %c0_4, %c0_5] : memref<4x640x128xf32, #tpu.memory_space<vmem>>, vector<1x640x128xf32>
    %22 = vector.shape_cast %21 : vector<1x640x128xf32> to vector<640x128xf32>
    %cst_6 = arith.constant dense<0.000000e+00> : vector<40x128xf32>
    %23 = tpu.matmul %20, %22, %cst_6 {dimension_numbers = #tpu.dot_dimension_numbers<[1], [0], [0], [1], [0, 0, 1, 1], [], []>} : vector<40x640xf32>, vector<640x128xf32>, vector<40x128xf32> -> vector<40x128xf32>
    %c0_7 = arith.constant 0 : index
    %c0_8 = arith.constant 0 : index
    %24 = vector.load %arg4[%c0_7, %c0_8] : memref<4x128xf32, #tpu.memory_space<vmem>>, vector<1x128xf32>
    %25 = vector.shape_cast %24 : vector<1x128xf32> to vector<128xf32>
    %26 = vector.shape_cast %25 : vector<128xf32> to vector<1x128xf32>
    %27 = vector.broadcast %26 : vector<1x128xf32> to vector<40x128xf32>
    %28 = arith.addf %23, %27 : vector<40x128xf32>
    %cst_9 = arith.constant 0.000000e+00 : f32
    %29 = vector.broadcast %cst_9 : f32 to vector<40x128xf32>
    %30 = arith.maximumf %28, %29 : vector<40x128xf32>
    %31 = vector.extract_strided_slice %30 {offsets = [0, 0], sizes = [16, 128], strides = [1, 1]} : vector<40x128xf32> to vector<16x128xf32>
    %32 = vector.extract_strided_slice %30 {offsets = [1, 0], sizes = [16, 128], strides = [1, 1]} : vector<40x128xf32> to vector<16x128xf32>
    %33 = vector.extract_strided_slice %30 {offsets = [2, 0], sizes = [16, 128], strides = [1, 1]} : vector<40x128xf32> to vector<16x128xf32>
    %34 = vector.extract_strided_slice %30 {offsets = [3, 0], sizes = [16, 128], strides = [1, 1]} : vector<40x128xf32> to vector<16x128xf32>
    %35 = vector.extract_strided_slice %30 {offsets = [4, 0], sizes = [16, 128], strides = [1, 1]} : vector<40x128xf32> to vector<16x128xf32>
    %36 = tpu.concatenate %31, %32, %33, %34, %35 in 1 : vector<16x128xf32>, vector<16x128xf32>, vector<16x128xf32>, vector<16x128xf32>, vector<16x128xf32> -> vector<16x640xf32>
    %37 = vector.extract_strided_slice %30 {offsets = [20, 0], sizes = [16, 128], strides = [1, 1]} : vector<40x128xf32> to vector<16x128xf32>
    %38 = vector.extract_strided_slice %30 {offsets = [21, 0], sizes = [16, 128], strides = [1, 1]} : vector<40x128xf32> to vector<16x128xf32>
    %39 = vector.extract_strided_slice %30 {offsets = [22, 0], sizes = [16, 128], strides = [1, 1]} : vector<40x128xf32> to vector<16x128xf32>
    %40 = vector.extract_strided_slice %30 {offsets = [23, 0], sizes = [16, 128], strides = [1, 1]} : vector<40x128xf32> to vector<16x128xf32>
    %41 = vector.extract_strided_slice %30 {offsets = [24, 0], sizes = [16, 128], strides = [1, 1]} : vector<40x128xf32> to vector<16x128xf32>
    %42 = tpu.concatenate %37, %38, %39, %40, %41 in 1 : vector<16x128xf32>, vector<16x128xf32>, vector<16x128xf32>, vector<16x128xf32>, vector<16x128xf32> -> vector<16x640xf32>
    %43 = tpu.concatenate %36, %42 in 0 : vector<16x640xf32>, vector<16x640xf32> -> vector<32x640xf32>
    %c1 = arith.constant 1 : index
    %c0_10 = arith.constant 0 : index
    %c0_11 = arith.constant 0 : index
    %44 = vector.load %arg3[%c1, %c0_10, %c0_11] : memref<4x640x128xf32, #tpu.memory_space<vmem>>, vector<1x640x128xf32>
    %45 = vector.shape_cast %44 : vector<1x640x128xf32> to vector<640x128xf32>
    %cst_12 = arith.constant dense<0.000000e+00> : vector<32x128xf32>
    %46 = tpu.matmul %43, %45, %cst_12 {dimension_numbers = #tpu.dot_dimension_numbers<[1], [0], [0], [1], [0, 0, 1, 1], [], []>} : vector<32x640xf32>, vector<640x128xf32>, vector<32x128xf32> -> vector<32x128xf32>
    %c1_13 = arith.constant 1 : index
    %c0_14 = arith.constant 0 : index
    %47 = vector.load %arg4[%c1_13, %c0_14] : memref<4x128xf32, #tpu.memory_space<vmem>>, vector<1x128xf32>
    %48 = vector.shape_cast %47 : vector<1x128xf32> to vector<128xf32>
    %49 = vector.shape_cast %48 : vector<128xf32> to vector<1x128xf32>
    %50 = vector.broadcast %49 : vector<1x128xf32> to vector<32x128xf32>
    %51 = arith.addf %46, %50 : vector<32x128xf32>
    %cst_15 = arith.constant 0.000000e+00 : f32
    %52 = vector.broadcast %cst_15 : f32 to vector<32x128xf32>
    %53 = arith.maximumf %51, %52 : vector<32x128xf32>
    %54 = vector.extract_strided_slice %53 {offsets = [0, 0], sizes = [12, 128], strides = [1, 1]} : vector<32x128xf32> to vector<12x128xf32>
    %55 = vector.extract_strided_slice %53 {offsets = [1, 0], sizes = [12, 128], strides = [1, 1]} : vector<32x128xf32> to vector<12x128xf32>
    %56 = vector.extract_strided_slice %53 {offsets = [2, 0], sizes = [12, 128], strides = [1, 1]} : vector<32x128xf32> to vector<12x128xf32>
    %57 = vector.extract_strided_slice %53 {offsets = [3, 0], sizes = [12, 128], strides = [1, 1]} : vector<32x128xf32> to vector<12x128xf32>
    %58 = vector.extract_strided_slice %53 {offsets = [4, 0], sizes = [12, 128], strides = [1, 1]} : vector<32x128xf32> to vector<12x128xf32>
    %59 = tpu.concatenate %54, %55, %56, %57, %58 in 1 : vector<12x128xf32>, vector<12x128xf32>, vector<12x128xf32>, vector<12x128xf32>, vector<12x128xf32> -> vector<12x640xf32>
    %60 = vector.extract_strided_slice %53 {offsets = [16, 0], sizes = [12, 128], strides = [1, 1]} : vector<32x128xf32> to vector<12x128xf32>
    %61 = vector.extract_strided_slice %53 {offsets = [17, 0], sizes = [12, 128], strides = [1, 1]} : vector<32x128xf32> to vector<12x128xf32>
    %62 = vector.extract_strided_slice %53 {offsets = [18, 0], sizes = [12, 128], strides = [1, 1]} : vector<32x128xf32> to vector<12x128xf32>
    %63 = vector.extract_strided_slice %53 {offsets = [19, 0], sizes = [12, 128], strides = [1, 1]} : vector<32x128xf32> to vector<12x128xf32>
    %64 = vector.extract_strided_slice %53 {offsets = [20, 0], sizes = [12, 128], strides = [1, 1]} : vector<32x128xf32> to vector<12x128xf32>
    %65 = tpu.concatenate %60, %61, %62, %63, %64 in 1 : vector<12x128xf32>, vector<12x128xf32>, vector<12x128xf32>, vector<12x128xf32>, vector<12x128xf32> -> vector<12x640xf32>
    %66 = tpu.concatenate %59, %65 in 0 : vector<12x640xf32>, vector<12x640xf32> -> vector<24x640xf32>
    %c2 = arith.constant 2 : index
    %c0_16 = arith.constant 0 : index
    %c0_17 = arith.constant 0 : index
    %67 = vector.load %arg3[%c2, %c0_16, %c0_17] : memref<4x640x128xf32, #tpu.memory_space<vmem>>, vector<1x640x128xf32>
    %68 = vector.shape_cast %67 : vector<1x640x128xf32> to vector<640x128xf32>
    %cst_18 = arith.constant dense<0.000000e+00> : vector<24x128xf32>
    %69 = tpu.matmul %66, %68, %cst_18 {dimension_numbers = #tpu.dot_dimension_numbers<[1], [0], [0], [1], [0, 0, 1, 1], [], []>} : vector<24x640xf32>, vector<640x128xf32>, vector<24x128xf32> -> vector<24x128xf32>
    %c2_19 = arith.constant 2 : index
    %c0_20 = arith.constant 0 : index
    %70 = vector.load %arg4[%c2_19, %c0_20] : memref<4x128xf32, #tpu.memory_space<vmem>>, vector<1x128xf32>
    %71 = vector.shape_cast %70 : vector<1x128xf32> to vector<128xf32>
    %72 = vector.shape_cast %71 : vector<128xf32> to vector<1x128xf32>
    %73 = vector.broadcast %72 : vector<1x128xf32> to vector<24x128xf32>
    %74 = arith.addf %69, %73 : vector<24x128xf32>
    %cst_21 = arith.constant 0.000000e+00 : f32
    %75 = vector.broadcast %cst_21 : f32 to vector<24x128xf32>
    %76 = arith.maximumf %74, %75 : vector<24x128xf32>
    %77 = vector.extract_strided_slice %76 {offsets = [0, 0], sizes = [8, 128], strides = [1, 1]} : vector<24x128xf32> to vector<8x128xf32>
    %78 = vector.extract_strided_slice %76 {offsets = [1, 0], sizes = [8, 128], strides = [1, 1]} : vector<24x128xf32> to vector<8x128xf32>
    %79 = vector.extract_strided_slice %76 {offsets = [2, 0], sizes = [8, 128], strides = [1, 1]} : vector<24x128xf32> to vector<8x128xf32>
    %80 = vector.extract_strided_slice %76 {offsets = [3, 0], sizes = [8, 128], strides = [1, 1]} : vector<24x128xf32> to vector<8x128xf32>
    %81 = vector.extract_strided_slice %76 {offsets = [4, 0], sizes = [8, 128], strides = [1, 1]} : vector<24x128xf32> to vector<8x128xf32>
    %82 = tpu.concatenate %77, %78, %79, %80, %81 in 1 : vector<8x128xf32>, vector<8x128xf32>, vector<8x128xf32>, vector<8x128xf32>, vector<8x128xf32> -> vector<8x640xf32>
    %83 = vector.extract_strided_slice %76 {offsets = [12, 0], sizes = [8, 128], strides = [1, 1]} : vector<24x128xf32> to vector<8x128xf32>
    %84 = vector.extract_strided_slice %76 {offsets = [13, 0], sizes = [8, 128], strides = [1, 1]} : vector<24x128xf32> to vector<8x128xf32>
    %85 = vector.extract_strided_slice %76 {offsets = [14, 0], sizes = [8, 128], strides = [1, 1]} : vector<24x128xf32> to vector<8x128xf32>
    %86 = vector.extract_strided_slice %76 {offsets = [15, 0], sizes = [8, 128], strides = [1, 1]} : vector<24x128xf32> to vector<8x128xf32>
    %87 = vector.extract_strided_slice %76 {offsets = [16, 0], sizes = [8, 128], strides = [1, 1]} : vector<24x128xf32> to vector<8x128xf32>
    %88 = tpu.concatenate %83, %84, %85, %86, %87 in 1 : vector<8x128xf32>, vector<8x128xf32>, vector<8x128xf32>, vector<8x128xf32>, vector<8x128xf32> -> vector<8x640xf32>
    %89 = tpu.concatenate %82, %88 in 0 : vector<8x640xf32>, vector<8x640xf32> -> vector<16x640xf32>
    %c3 = arith.constant 3 : index
    %c0_22 = arith.constant 0 : index
    %c0_23 = arith.constant 0 : index
    %90 = vector.load %arg3[%c3, %c0_22, %c0_23] : memref<4x640x128xf32, #tpu.memory_space<vmem>>, vector<1x640x128xf32>
    %91 = vector.shape_cast %90 : vector<1x640x128xf32> to vector<640x128xf32>
    %cst_24 = arith.constant dense<0.000000e+00> : vector<16x128xf32>
    %92 = tpu.matmul %89, %91, %cst_24 {dimension_numbers = #tpu.dot_dimension_numbers<[1], [0], [0], [1], [0, 0, 1, 1], [], []>} : vector<16x640xf32>, vector<640x128xf32>, vector<16x128xf32> -> vector<16x128xf32>
    %c3_25 = arith.constant 3 : index
    %c0_26 = arith.constant 0 : index
    %93 = vector.load %arg4[%c3_25, %c0_26] : memref<4x128xf32, #tpu.memory_space<vmem>>, vector<1x128xf32>
    %94 = vector.shape_cast %93 : vector<1x128xf32> to vector<128xf32>
    %95 = vector.shape_cast %94 : vector<128xf32> to vector<1x128xf32>
    %96 = vector.broadcast %95 : vector<1x128xf32> to vector<16x128xf32>
    %97 = arith.addf %92, %96 : vector<16x128xf32>
    %cst_27 = arith.constant 0.000000e+00 : f32
    %98 = vector.broadcast %cst_27 : f32 to vector<16x128xf32>
    %99 = arith.maximumf %97, %98 : vector<16x128xf32>
    %100 = vector.extract_strided_slice %99 {offsets = [0, 0], sizes = [8, 128], strides = [1, 1]} : vector<16x128xf32> to vector<8x128xf32>
    %cst_28 = arith.constant dense<0.000000e+00> : vector<128xf32>
    %101 = vector.multi_reduction <add>, %100, %cst_28 [0] : vector<8x128xf32> to vector<128xf32>
    %102 = vector.shape_cast %101 : vector<128xf32> to vector<1x128xf32>
    %103 = vector.extract_strided_slice %99 {offsets = [8, 0], sizes = [8, 128], strides = [1, 1]} : vector<16x128xf32> to vector<8x128xf32>
    %cst_29 = arith.constant dense<0.000000e+00> : vector<128xf32>
    %104 = vector.multi_reduction <add>, %103, %cst_29 [0] : vector<8x128xf32> to vector<128xf32>
    %105 = vector.shape_cast %104 : vector<128xf32> to vector<1x128xf32>
    %106 = tpu.concatenate %102, %105 in 0 : vector<1x128xf32>, vector<1x128xf32> -> vector<2x128xf32>
    %c0_30 = arith.constant 0 : index
    %c0_31 = arith.constant 0 : index
    %107 = vector.load %arg5[%c0_30, %c0_31] : memref<1x128xf32, #tpu.memory_space<vmem>>, vector<1x128xf32>
    %108 = vector.broadcast %107 : vector<1x128xf32> to vector<2x128xf32>
    %109 = arith.mulf %106, %108 : vector<2x128xf32>
    %cst_32 = arith.constant dense<0.000000e+00> : vector<2xf32>
    %110 = vector.multi_reduction <add>, %109, %cst_32 [1] : vector<2x128xf32> to vector<2xf32>
    %111 = vector.shape_cast %110 : vector<2xf32> to vector<2x1xf32>
    %c0_33 = arith.constant 0 : index
    %c0_34 = arith.constant 0 : index
    %112 = vector.load %arg6[%c0_33, %c0_34] : memref<1x1xf32, #tpu.memory_space<vmem>>, vector<1x1xf32>
    %113 = vector.broadcast %112 : vector<1x1xf32> to vector<2x1xf32>
    %114 = arith.addf %111, %113 : vector<2x1xf32>
    %c0_35 = arith.constant 0 : index
    %c0_36 = arith.constant 0 : index
    %115 = vector.load %arg7[%c0_35, %c0_36] : memref<2x1xf32, #tpu.memory_space<vmem>>, vector<2x1xf32>
    tpu.vector_store %arg7[%c0_35, %c0_36], %114 {strides = array<i32>} : memref<2x1xf32, #tpu.memory_space<vmem>>, vector<2x1xf32>,
    return
  }
  func.func @transform_0(%arg0: i32) -> (i32, i32) {
    %c0_i32 = arith.constant 0 : i32
    %c0_i32_0 = arith.constant 0 : i32
    %c0_i32_1 = arith.constant 0 : i32
    return %c0_i32, %c0_i32_0 : i32, i32
  }
  func.func @transform_1(%arg0: i32) -> (i32, i32) {
    %c0_i32 = arith.constant 0 : i32
    %c0_i32_0 = arith.constant 0 : i32
    %c0_i32_1 = arith.constant 0 : i32
    return %c0_i32, %c0_i32_0 : i32, i32
  }
  func.func @transform_2(%arg0: i32) -> (i32, i32, i32) {
    %c0_i32 = arith.constant 0 : i32
    %c0_i32_0 = arith.constant 0 : i32
    %c0_i32_1 = arith.constant 0 : i32
    %c0_i32_2 = arith.constant 0 : i32
    return %c0_i32, %c0_i32_0, %c0_i32_1 : i32, i32, i32
  }
  func.func @transform_3(%arg0: i32) -> (i32, i32) {
    %c0_i32 = arith.constant 0 : i32
    %c0_i32_0 = arith.constant 0 : i32
    %c0_i32_1 = arith.constant 0 : i32
    return %c0_i32, %c0_i32_0 : i32, i32
  }
  func.func @transform_4(%arg0: i32) -> (i32, i32) {
    %c0_i32 = arith.constant 0 : i32
    %c0_i32_0 = arith.constant 0 : i32
    %c0_i32_1 = arith.constant 0 : i32
    return %c0_i32, %c0_i32_0 : i32, i32
  }
  func.func @transform_5(%arg0: i32) -> (i32, i32) {
    %c0_i32 = arith.constant 0 : i32
    %c0_i32_0 = arith.constant 0 : i32
    %c0_i32_1 = arith.constant 0 : i32
    return %c0_i32, %c0_i32_0 : i32, i32
  }
  func.func @transform_6(%arg0: i32) -> (i32, i32) {
    %c0_i32 = arith.constant 0 : i32
    %c0_i32_0 = arith.constant 0 : i32
    %c0_i32_1 = arith.constant 0 : i32
    return %c0_i32, %c0_i32_0 : i32, i32
  }
}

</mosaic_0001>

<bundles_post_ra>
// kernel: cnn_model_forward.1
= control target key start
LH: loop header
LB: loop body
LE: loop exit
PB: predicated region body
PF: predicated region fallthrough
CT: control target
= control target key end

     0   :  { %v1697_v0 = vmov 0   ;;  %v31_v39 = vlaneseq  ;;  %v1698_v43 = vmov 1.0   ;;  %vm193_vm12 = vcmask 1046528   ;;  %s3105_s0 = inlined_call_operand.vmem [shape: s32[48,1], index: 0, kind: input, shape index: {}]   ;;  %s3106_s1 = inlined_call_operand.vmem [shape: f32[256,128], index: 1, kind: input, shape index: {}]   ;;  %s3107_s2 = inlined_call_operand.vmem [shape: f32[4,640,128], index: 2, kind: input, shape index: {}]   ;;  %s3108_s3 = inlined_call_operand.vmem [shape: f32[4,128], index: 3, kind: input, shape index: {}]   ;;  %s3109_s4 = inlined_call_operand.vmem [shape: f32[1,128], index: 4, kind: input, shape index: {}]   ;;  %s3110_s5 = inlined_call_operand.<no memory space> [shape: f32[1,1], index: 5, kind: input, shape index: {}]   ;;  %s3111_s6 = inlined_call_operand.vmem [shape: f32[2,1], index: 6, kind: output, shape index: {}]  }
   0x1   :  { %1688 = vset.pattern.permute.xlu0 %v1697_v0  ;;  %v25_v1 = vld [vmem:[%s3105_s0] sm:$0xff]  ;;  %1689 = vset.pattern.permute.xlu1 %v1697_v0  ;;  %v27_v2 = vld [vmem:[%s3105_s0 + $0x10] sm:$0xff]  ;;  %v103_v4 = vld [vmem:[%s3106_s1 + $0x78] sm:$0xff]  ;;  %vm220_vm13 = vcmask 1043456   ;;  %vm202_vm14 = vcmask 1045504   ;;  %vm211_vm15 = vcmask 1044480  }
   0x2   :  { %35 = vperm.xlu0 %1688, %v25_v1   ;;  %41 = vperm.xlu1 %1689, %v27_v2   ;;  %v29_v3 = vld [vmem:[%s3105_s0 + $0x20] sm:$0xff]  ;;  %v119_v5 = vld [vmem:[%s3106_s1 + $0xf8] sm:$0xff]  ;;  %v102_v6 = vld [vmem:[%s3106_s1 + $0x70] sm:$0xff]  ;;  %v1848_v40 = vand.u32 127, %v31_v39 }
   0x3   :  { %1690 = vset.pattern.permute.xlu2 %v1697_v0  ;;  %120 = vmatpush.msra.mxu0 %v103_v4  ;;  %v118_v7 = vld [vmem:[%s3106_s1 + $0xf0] sm:$0xff]  ;;  %v101_v8 = vld [vmem:[%s3106_s1 + $0x68] sm:$0xff]  ;;  %v28_v11 = vld [vmem:[%s3105_s0 + $0x18] sm:$0xff] }
   0x4   :  { %47 = vperm.xlu2 %1690, %v29_v3   ;;  %155 = vmatpush.msra.mxu1 %v119_v5  ;;  %v117_v9 = vld [vmem:[%s3106_s1 + $0xe8] sm:$0xff]  ;;  %v100_v12 = vld [vmem:[%s3106_s1 + $0x60] sm:$0xff]  ;;  %v99_v15 = vld [vmem:[%s3106_s1 + $0x58] sm:$0xff]  ;;  %v1851_v41 = vadd.s32 128, %v1848_v40 }
   0x5   :  { %121 = vmatpush.msra.mxu0 %v102_v6  ;;  %v26_v10 = vld [vmem:[%s3105_s0 + $0x8] sm:$0xff]  ;;  %v116_v13 = vld [vmem:[%s3106_s1 + $0xe0] sm:$0xff]  ;;  %v115_v16 = vld [vmem:[%s3106_s1 + $0xd8] sm:$0xff] }
   0x6   :  { %156 = vmatpush.msra.mxu1 %v118_v7  ;;  %v30_v14 = vld [vmem:[%s3105_s0 + $0x28] sm:$0xff]  ;;  %v98_v17 = vld [vmem:[%s3106_s1 + $0x50] sm:$0xff]  ;;  %v96_v21 = vld [vmem:[%s3106_s1 + $0x40] sm:$0xff] }
   0x7   :  { %122 = vmatpush.msra.mxu0 %v101_v8  ;;  %v114_v18 = vld [vmem:[%s3106_s1 + $0xd0] sm:$0xff]  ;;  %v97_v19 = vld [vmem:[%s3106_s1 + $0x48] sm:$0xff]  ;;  %v112_v22 = vld [vmem:[%s3106_s1 + $0xc0] sm:$0xff] }
   0x8   :  { %157 = vmatpush.msra.mxu1 %v117_v9  ;;  %v113_v20 = vld [vmem:[%s3106_s1 + $0xc8] sm:$0xff]  ;;  %v95_v23 = vld [vmem:[%s3106_s1 + $0x38] sm:$0xff]  ;;  %v94_v25 = vld [vmem:[%s3106_s1 + $0x30] sm:$0xff] }
   0x9   :  { %123 = vmatpush.msra.mxu0 %v100_v12  ;;  %v111_v24 = vld [vmem:[%s3106_s1 + $0xb8] sm:$0xff]  ;;  %v110_v26 = vld [vmem:[%s3106_s1 + $0xb0] sm:$0xff]  ;;  %v93_v27 = vld [vmem:[%s3106_s1 + $0x28] sm:$0xff] }
   0xa   :  { %38 = vperm.xlu0 %1688, %v26_v10   ;;  %44 = vperm.xlu1 %1689, %v28_v11   ;;  %v109_v28 = vld [vmem:[%s3106_s1 + $0xa8] sm:$0xff]  ;;  %v92_v29 = vld [vmem:[%s3106_s1 + $0x20] sm:$0xff]  ;;  %v91_v31 = vld [vmem:[%s3106_s1 + $0x18] sm:$0xff] }
   0xb   :  { %158 = vmatpush.msra.mxu1 %v116_v13  ;;  %124 = vmatpush.msra.mxu0 %v99_v15  ;;  %v108_v30 = vld [vmem:[%s3106_s1 + $0xa0] sm:$0xff]  ;;  %v107_v32 = vld [vmem:[%s3106_s1 + $0x98] sm:$0xff]  ;;  %v90_v33 = vld [vmem:[%s3106_s1 + $0x10] sm:$0xff] }
   0xc   :  { %50 = vperm.xlu2 %1690, %v30_v14   ;;  %v106_v34 = vld [vmem:[%s3106_s1 + $0x90] sm:$0xff]  ;;  %v89_v35 = vld [vmem:[%s3106_s1 + $0x8] sm:$0xff]  ;;  %v88_v37 = vld [vmem:[%s3106_s1] sm:$0xff] }
   0xd   :  { %159 = vmatpush.msra.mxu1 %v115_v16  ;;  %125 = vmatpush.msra.mxu0 %v98_v17  ;;  %v105_v36 = vld [vmem:[%s3106_s1 + $0x88] sm:$0xff]  ;;  %v104_v38 = vld [vmem:[%s3106_s1 + $0x80] sm:$0xff]  ;;  %v307_v45 = vld [vmem:[%s3107_s2 + $0x78] sm:$0xff] }
   0xe   :  { %v306_v46 = vld [vmem:[%s3107_s2 + $0x70] sm:$0xff]  ;;  %374 = vmatpush.msra.mxu2 %v307_v45  ;;  %v305_v48 = vld [vmem:[%s3107_s2 + $0x68] sm:$0xff]  ;;  %v323_v49 = vld [vmem:[%s3107_s2 + $0xf8] sm:$0xff] }
   0xf   :  { %160 = vmatpush.msra.mxu1 %v114_v18  ;;  %126 = vmatpush.msra.mxu0 %v97_v19  ;;  %v371_v50 = vld [vmem:[%s3107_s2 + $0x278] sm:$0xff]  ;;  %v322_v51 = vld [vmem:[%s3107_s2 + $0xf0] sm:$0xff]  ;;  %v304_v53 = vld [vmem:[%s3107_s2 + $0x60] sm:$0xff] }
  0x10   :  { %375 = vmatpush.msra.mxu2 %v306_v46  ;;  %406 = vmatpush.msra.mxu3 %v323_v49  ;;  %v370_v52 = vld [vmem:[%s3107_s2 + $0x270] sm:$0xff]  ;;  %v321_v54 = vld [vmem:[%s3107_s2 + $0xe8] sm:$0xff]  ;;  %v303_v55 = vld [vmem:[%s3107_s2 + $0x58] sm:$0xff] }
  0x11   :  { %161 = vmatpush.msra.mxu1 %v113_v20  ;;  %127 = vmatpush.msra.mxu0 %v96_v21  ;;  %v369_v56 = vld [vmem:[%s3107_s2 + $0x268] sm:$0xff]  ;;  %v320_v57 = vld [vmem:[%s3107_s2 + $0xe0] sm:$0xff]  ;;  %v302_v58 = vld [vmem:[%s3107_s2 + $0x50] sm:$0xff] }
  0x12   :  { %376 = vmatpush.msra.mxu2 %v305_v48  ;;  %407 = vmatpush.msra.mxu3 %v322_v51  ;;  %v368_v59 = vld [vmem:[%s3107_s2 + $0x260] sm:$0xff]  ;;  %v319_v60 = vld [vmem:[%s3107_s2 + $0xd8] sm:$0xff]  ;;  %v301_v61 = vld [vmem:[%s3107_s2 + $0x48] sm:$0xff] }
  0x13   :  { %162 = vmatpush.msra.mxu1 %v112_v22  ;;  %128 = vmatpush.msra.mxu0 %v95_v23  ;;  %v367_v62 = vld [vmem:[%s3107_s2 + $0x258] sm:$0xff]  ;;  %v318_v63 = vld [vmem:[%s3107_s2 + $0xd0] sm:$0xff]  ;;  %v300_v1 = vld [vmem:[%s3107_s2 + $0x40] sm:$0xff] }
  0x14   :  { %377 = vmatpush.msra.mxu2 %v304_v53  ;;  %408 = vmatpush.msra.mxu3 %v321_v54  ;;  %v366_v2 = vld [vmem:[%s3107_s2 + $0x250] sm:$0xff]  ;;  %v299_v3 = vld [vmem:[%s3107_s2 + $0x38] sm:$0xff]  ;;  %v317_v4 = vld [vmem:[%s3107_s2 + $0xc8] sm:$0xff] }
  0x15   :  { %163 = vmatpush.msra.mxu1 %v111_v24  ;;  %129 = vmatpush.msra.mxu0 %v94_v25  ;;  %v365_v5 = vld [vmem:[%s3107_s2 + $0x248] sm:$0xff]  ;;  %v298_v6 = vld [vmem:[%s3107_s2 + $0x30] sm:$0xff]  ;;  %v316_v7 = vld [vmem:[%s3107_s2 + $0xc0] sm:$0xff] }
  0x16   :  { %378 = vmatpush.msra.mxu2 %v303_v55  ;;  %409 = vmatpush.msra.mxu3 %v320_v57  ;;  %v364_v8 = vld [vmem:[%s3107_s2 + $0x240] sm:$0xff]  ;;  %v297_v10 = vld [vmem:[%s3107_s2 + $0x28] sm:$0xff]  ;;  %v315_v11 = vld [vmem:[%s3107_s2 + $0xb8] sm:$0xff] }
  0x17   :  { %164 = vmatpush.msra.mxu1 %v110_v26  ;;  %130 = vmatpush.msra.mxu0 %v93_v27  ;;  %v363_v12 = vld [vmem:[%s3107_s2 + $0x238] sm:$0xff]  ;;  %v296_v13 = vld [vmem:[%s3107_s2 + $0x20] sm:$0xff]  ;;  %v294_v15 = vld [vmem:[%s3107_s2 + $0x10] sm:$0xff] }
  0x18   :  { %379 = vmatpush.msra.mxu2 %v302_v58  ;;  %410 = vmatpush.msra.mxu3 %v319_v60  ;;  %v295_v14 = vld [vmem:[%s3107_s2 + $0x18] sm:$0xff]  ;;  %v293_v17 = vld [vmem:[%s3107_s2 + $0x8] sm:$0xff]  ;;  %v314_v18 = vld [vmem:[%s3107_s2 + $0xb0] sm:$0xff] }
  0x19   :  { %165 = vmatpush.msra.mxu1 %v109_v28  ;;  %131 = vmatpush.msra.mxu0 %v92_v29  ;;  %v362_v19 = vld [vmem:[%s3107_s2 + $0x230] sm:$0xff]  ;;  %v292_v20 = vld [vmem:[%s3107_s2] sm:$0xff]  ;;  %v313_v21 = vld [vmem:[%s3107_s2 + $0xa8] sm:$0xff] }
  0x1a   :  { %380 = vmatpush.msra.mxu2 %v301_v61  ;;  %411 = vmatpush.msra.mxu3 %v318_v63  ;;  %v361_v22 = vld [vmem:[%s3107_s2 + $0x228] sm:$0xff]  ;;  %v312_v23 = vld [vmem:[%s3107_s2 + $0xa0] sm:$0xff]  ;;  %v311_v25 = vld [vmem:[%s3107_s2 + $0x98] sm:$0xff] }
  0x1b   :  { %166 = vmatpush.msra.mxu1 %v108_v30  ;;  %132 = vmatpush.msra.mxu0 %v91_v31  ;;  %v360_v24 = vld [vmem:[%s3107_s2 + $0x220] sm:$0xff]  ;;  %v359_v26 = vld [vmem:[%s3107_s2 + $0x218] sm:$0xff]  ;;  %v310_v27 = vld [vmem:[%s3107_s2 + $0x90] sm:$0xff] }
  0x1c   :  { %381 = vmatpush.msra.mxu2 %v300_v1  ;;  %412 = vmatpush.msra.mxu3 %v317_v4  ;;  %v358_v28 = vld [vmem:[%s3107_s2 + $0x210] sm:$0xff]  ;;  %v309_v29 = vld [vmem:[%s3107_s2 + $0x88] sm:$0xff]  ;;  %v308_v31 = vld [vmem:[%s3107_s2 + $0x80] sm:$0xff] }
  0x1d   :  { %167 = vmatpush.msra.mxu1 %v107_v32  ;;  %133 = vmatpush.msra.mxu0 %v90_v33  ;;  %v357_v30 = vld [vmem:[%s3107_s2 + $0x208] sm:$0xff]  ;;  %v356_v32 = vld [vmem:[%s3107_s2 + $0x200] sm:$0xff]  ;;  %v339_v33 = vld [vmem:[%s3107_s2 + $0x178] sm:$0xff] }
  0x1e   :  { %382 = vmatpush.msra.mxu2 %v299_v3  ;;  %413 = vmatpush.msra.mxu3 %v316_v7  ;;  %v353_v39 = vld [vmem:[%s3107_s2 + $0x1e8] sm:$0xff]  ;;  %v352_v46 = vld [vmem:[%s3107_s2 + $0x1e0] sm:$0xff]  ;;  %v350_v49 = vld [vmem:[%s3107_s2 + $0x1d0] sm:$0xff] }
  0x1f   :  { %168 = vmatpush.msra.mxu1 %v106_v34  ;;  %134 = vmatpush.msra.mxu0 %v89_v35  ;;  %v338_v34 = vld [vmem:[%s3107_s2 + $0x170] sm:$0xff]  ;;  %v337_v35 = vld [vmem:[%s3107_s2 + $0x168] sm:$0xff]  ;;  %v332_v48 = vld [vmem:[%s3107_s2 + $0x140] sm:$0xff] }
  0x20   :  { %383 = vmatpush.msra.mxu2 %v298_v6  ;;  %414 = vmatpush.msra.mxu3 %v315_v11  ;;  %v333_v45 = vld [vmem:[%s3107_s2 + $0x148] sm:$0xff]  ;;  %v330_v53 = vld [vmem:[%s3107_s2 + $0x130] sm:$0xff]  ;;  %v348_v61 = vld [vmem:[%s3107_s2 + $0x1c0] sm:$0xff] }
  0x21   :  { %169 = vmatpush.msra.mxu1 %v105_v36  ;;  %135 = vmatpush.msra.mxu0 %v88_v37  ;;  %v355_v36 = vld [vmem:[%s3107_s2 + $0x1f8] sm:$0xff]  ;;  %v354_v37 = vld [vmem:[%s3107_s2 + $0x1f0] sm:$0xff]  ;;  %v329_v55 = vld [vmem:[%s3107_s2 + $0x128] sm:$0xff] }
  0x22   :  { %384 = vmatpush.msra.mxu2 %v297_v10  ;;  %415 = vmatpush.msra.mxu3 %v314_v18  ;;  %v349_v60 = vld [vmem:[%s3107_s2 + $0x1c8] sm:$0xff]  ;;  %v347_v1 = vld [vmem:[%s3107_s2 + $0x1b8] sm:$0xff]  ;;  %v326_v6 = vld [vmem:[%s3107_s2 + $0x110] sm:$0xff] }
  0x23   :  { %170 = vmatpush.msra.mxu1 %v104_v38  ;;  %502 = vmatpush.msrb.mxu0 %v371_v50  ;;  %v336_v38 = vld [vmem:[%s3107_s2 + $0x160] sm:$0xff]  ;;  %v331_v50 = vld [vmem:[%s3107_s2 + $0x138] sm:$0xff] }
  0x24   :  { %385 = vmatpush.msra.mxu2 %v296_v13  ;;  %416 = vmatpush.msra.mxu3 %v313_v21  ;;  %v344_v13 = vld [vmem:[%s3107_s2 + $0x1a0] sm:$0xff]  ;;  %v341_v21 = vld [vmem:[%s3107_s2 + $0x188] sm:$0xff] }
  0x25   :  { %503 = vmatpush.msrb.mxu0 %v370_v52 }
  0x26   :  { %386 = vmatpush.msra.mxu2 %v295_v14  ;;  %417 = vmatpush.msra.mxu3 %v312_v23 }
  0x27   :  { %504 = vmatpush.msrb.mxu0 %v369_v56 }
  0x28   :  { %387 = vmatpush.msra.mxu2 %v294_v15  ;;  %418 = vmatpush.msra.mxu3 %v311_v25 }
  0x29   :  { %505 = vmatpush.msrb.mxu0 %v368_v59 }
  0x2a   :  { %388 = vmatpush.msra.mxu2 %v293_v17  ;;  %419 = vmatpush.msra.mxu3 %v310_v27 }
  0x2b   :  { %506 = vmatpush.msrb.mxu0 %v367_v62  ;;  %v328_v62 = vld [vmem:[%s3107_s2 + $0x120] sm:$0xff] }
  0x2c   :  { %389 = vmatpush.msra.mxu2 %v292_v20  ;;  %420 = vmatpush.msra.mxu3 %v309_v29  ;;  %v342_v20 = vld [vmem:[%s3107_s2 + $0x190] sm:$0xff] }
  0x2d   :  { %507 = vmatpush.msrb.mxu0 %v366_v2  ;;  %v327_v2 = vld [vmem:[%s3107_s2 + $0x118] sm:$0xff] }
  0x2e   :  { %421 = vmatpush.msra.mxu3 %v308_v31  ;;  %438 = vmatpush.msrb.mxu2 %v339_v33 }
  0x2f   :  { %508 = vmatpush.msrb.mxu0 %v365_v5  ;;  %v346_v5 = vld [vmem:[%s3107_s2 + $0x1b0] sm:$0xff] }
  0x30   :  { %439 = vmatpush.msrb.mxu2 %v338_v34  ;;  %470 = vmatpush.msrb.mxu3 %v355_v36 }
  0x31   :  { %509 = vmatpush.msrb.mxu0 %v364_v8  ;;  %v345_v8 = vld [vmem:[%s3107_s2 + $0x1a8] sm:$0xff] }
  0x32   :  { %440 = vmatpush.msrb.mxu2 %v337_v35  ;;  %471 = vmatpush.msrb.mxu3 %v354_v37 }
  0x33   :  { %510 = vmatpush.msrb.mxu0 %v363_v12  ;;  %v324_v12 = vld [vmem:[%s3107_s2 + $0x100] sm:$0xff] }
  0x34   :  { %441 = vmatpush.msrb.mxu2 %v336_v38  ;;  %472 = vmatpush.msrb.mxu3 %v353_v39 }
  0x35   :  { %511 = vmatpush.msrb.mxu0 %v362_v19 }
  0x36   :  { %473 = vmatpush.msrb.mxu3 %v352_v46 }
  0x37   :  { %512 = vmatpush.msrb.mxu0 %v361_v22 }
  0x39   :  { %513 = vmatpush.msrb.mxu0 %v360_v24  ;;  %v340_v24 = vld [vmem:[%s3107_s2 + $0x180] sm:$0xff] }
  0x3b   :  { %514 = vmatpush.msrb.mxu0 %v359_v26 }
  0x3d   :  { %515 = vmatpush.msrb.mxu0 %v358_v28 }
  0x3f   :  { %516 = vmatpush.msrb.mxu0 %v357_v30 }
  0x41   :  { %517 = vmatpush.msrb.mxu0 %v356_v32 }
  0x5e   :  { %v48_v9 = vpop.permute.xlu2 %47 }
  0x5f   :  { %vm60_vm8 = vcmp.eq.s32.totalorder %v1848_v40, %v48_v9  ;;  %vm61_vm9 = vcmp.eq.s32.totalorder %v1851_v41, %v48_v9  ;;  %v325_v9 = vld [vmem:[%s3107_s2 + $0x108] sm:$0xff] }
  0x66   :  { %v51_v16 = vpop.permute.xlu2 %50 }
  0x67   :  { %vm62_vm10 = vcmp.eq.s32.totalorder %v1848_v40, %v51_v16  ;;  %vm63_vm11 = vcmp.eq.s32.totalorder %v1851_v41, %v51_v16  ;;  %v343_v16 = vld [vmem:[%s3107_s2 + $0x198] sm:$0xff] }
  0x74   :  { %v36_v42 = vpop.permute.xlu0 %35  ;;  %v42_v47 = vpop.permute.xlu1 %41 }
  0x75   :  { %vm52_vm0 = vcmp.eq.s32.totalorder %v1848_v40, %v36_v42  ;;  %vm53_vm1 = vcmp.eq.s32.totalorder %v1851_v41, %v36_v42  ;;  %vm56_vm4 = vcmp.eq.s32.totalorder %v1848_v40, %v42_v47  ;;  %vm57_vm5 = vcmp.eq.s32.totalorder %v1851_v41, %v42_v47  ;;  %v351_v47 = vld [vmem:[%s3107_s2 + $0x1d8] sm:$0xff] }
  0x76   :  { %1418 = vmatmul.msk.f32.vlgmr.msra.gmra.mxu0 %vm52_vm0, %v1698_v43  ;;  %1424 = vmatmul.msk.f32.vlgmr.msra.gmra.mxu1 %vm53_vm1, %v1698_v43  ;;  %vm1384_vm0 = vcmask 1040384   ;;  %vm1391_vm1 = vcmask 1041408  }
  0x77   :  { %474 = vmatpush.msrb.mxu3 %v351_v47 }
  0x79   :  { %475 = vmatpush.msrb.mxu3 %v350_v49 }
  0x7b   :  { %476 = vmatpush.msrb.mxu3 %v349_v60 }
  0x7c   :  { %v39_v44 = vpop.permute.xlu0 %38  ;;  %v45_v0 = vpop.permute.xlu1 %44 }
  0x7d   :  { %vm54_vm2 = vcmp.eq.s32.totalorder %v1848_v40, %v39_v44  ;;  %vm55_vm3 = vcmp.eq.s32.totalorder %v1851_v41, %v39_v44  ;;  %vm58_vm6 = vcmp.eq.s32.totalorder %v1848_v40, %v45_v0  ;;  %vm59_vm7 = vcmp.eq.s32.totalorder %v1851_v41, %v45_v0  ;;  %v335_v40 = vld [vmem:[%s3107_s2 + $0x158] sm:$0xff]  ;;  %477 = vmatpush.msrb.mxu3 %v348_v61 }
  0x7e   :  { %1419 = vmatmul.msk.f32.gmra.mxu0 %vm54_vm2, %v1698_v43  ;;  %1425 = vmatmul.msk.f32.gmra.mxu1 %vm55_vm3, %v1698_v43  ;;  %vm1400_vm2 = vcmask 1024  }
  0x7f   :  { %442 = vmatpush.msrb.mxu2 %v335_v40  ;;  %478 = vmatpush.msrb.mxu3 %v347_v1 }
  0x81   :  { %479 = vmatpush.msrb.mxu3 %v346_v5 }
  0x83   :  { %480 = vmatpush.msrb.mxu3 %v345_v8 }
  0x85   :  { %481 = vmatpush.msrb.mxu3 %v344_v13 }
  0x86   :  { %1420 = vmatmul.msk.f32.gmra.mxu0 %vm56_vm4, %v1698_v43  ;;  %1426 = vmatmul.msk.f32.gmra.mxu1 %vm57_vm5, %v1698_v43 }
  0x87   :  { %482 = vmatpush.msrb.mxu3 %v343_v16 }
  0x89   :  { %483 = vmatpush.msrb.mxu3 %v342_v20  ;;  %v1445_v20 = vld [vmem:[%s3107_s2 + $0x2f8] sm:$0xff] }
  0x8a   :  { %701 = vmatpush.msrb.mxu1 %v1445_v20  ;;  %v1480_v20 = vld [vmem:[%s3107_s2 + $0x410] sm:$0xff] }
  0x8b   :  { %484 = vmatpush.msrb.mxu3 %v341_v21  ;;  %v1444_v21 = vld [vmem:[%s3107_s2 + $0x2f0] sm:$0xff] }
  0x8c   :  { %702 = vmatpush.msrb.mxu1 %v1444_v21  ;;  %v1496_v21 = vld [vmem:[%s3107_s2 + $0x490] sm:$0xff] }
  0x8d   :  { %485 = vmatpush.msrb.mxu3 %v340_v24 }
  0x8e   :  { %1421 = vmatmul.msk.f32.gmra.mxu0 %vm58_vm6, %v1698_v43  ;;  %1427 = vmatmul.msk.f32.gmra.mxu1 %vm59_vm7, %v1698_v43 }
  0x96   :  { %1422 = vmatmul.msk.f32.gmra.mxu0 %vm60_vm8, %v1698_v43  ;;  %1428 = vmatmul.msk.f32.gmra.mxu1 %vm61_vm9, %v1698_v43 }
  0x9e   :  { %1423 = vmatmul.msk.f32.gmra.mxu0 %vm62_vm10, %v1698_v43  ;;  %1429 = vmatmul.msk.f32.gmra.mxu1 %vm63_vm11, %v1698_v43  ;;  %v334_v43 = vld [vmem:[%s3107_s2 + $0x150] sm:$0xff] }
  0x9f   :  { %443 = vmatpush.msrb.mxu2 %v334_v43 }
  0xa1   :  { %444 = vmatpush.msrb.mxu2 %v333_v45 }
  0xa3   :  { %445 = vmatpush.msrb.mxu2 %v332_v48 }
  0xa5   :  { %446 = vmatpush.msrb.mxu2 %v331_v50 }
  0xa7   :  { %447 = vmatpush.msrb.mxu2 %v330_v53 }
  0xa9   :  { %448 = vmatpush.msrb.mxu2 %v329_v55 }
  0xab   :  { %449 = vmatpush.msrb.mxu2 %v328_v62 }
  0xad   :  { %450 = vmatpush.msrb.mxu2 %v327_v2 }
  0xaf   :  { %451 = vmatpush.msrb.mxu2 %v326_v6 }
  0xb1   :  { %452 = vmatpush.msrb.mxu2 %v325_v9 }
  0xb3   :  { %453 = vmatpush.msrb.mxu2 %v324_v12 }
  0xf3   :  { %v137_v41 = vpop.f32.mrf.mxu0  ;;  %v172_v42 = vpop.f32.mrf.mxu1 }
  0xf4   :  { %v2048_v44 = vadd.f32 %v172_v42, %v137_v41 }
  0xf6   :  { %390 = vmatmul.f32.vlgmr.msra.gmra.mxu2 %v2048_v44  ;;  %v194_v56 = vrot.slane %v2048_v44, 1  ;;  %v221_v58 = vrot.slane %v2048_v44, 4  ;;  %v203_v50 = vrot.slane %v2048_v44, 2  ;;  %v212_v62 = vrot.slane %v2048_v44, 3 }
  0xfb   :  { %v140_v51 = vpop.f32.mrf.mxu0  ;;  %v175_v52 = vpop.f32.mrf.mxu1 }
  0xfc   :  { %v2072_v54 = vadd.f32 %v175_v52, %v140_v51 }
  0xfe   :  { %393 = vmatmul.f32.gmra.mxu2 %v2072_v54  ;;  %v195_v57 = vrot.slane %v2072_v54, 1  ;;  %v222_v59 = vrot.slane %v2072_v54, 4  ;;  %v204_v49 = vrot.slane %v2072_v54, 2  ;;  %v213_v60 = vrot.slane %v2072_v54, 3 }
 0x100   :  { %v196_v63 = vsel %vm193_vm12, %v194_v56, %v195_v57  ;;  %v223_v0 = vsel %vm220_vm13, %v221_v58, %v222_v59  ;;  %v205_v53 = vsel %vm202_vm14, %v203_v50, %v204_v49 }
 0x101   :  { %422 = vmatmul.f32.vlgmr.msra.gmra.mxu3 %v196_v63  ;;  %518 = vmatmul.f32.vlgmr.msrb.gmra.mxu0 %v223_v0  ;;  %v214_v0 = vsel %vm211_vm15, %v212_v62, %v213_v60  ;;  %v1486_v62 = vld [vmem:[%s3107_s2 + $0x440] sm:$0xff] }
 0x103   :  { %v143_v3 = vpop.f32.mrf.mxu0  ;;  %v178_v4 = vpop.f32.mrf.mxu1 }
 0x104   :  { %v2105_v7 = vadd.f32 %v178_v4, %v143_v3 }
 0x106   :  { %v197_v10 = vrot.slane %v2105_v7, 1  ;;  %v224_v11 = vrot.slane %v2105_v7, 4  ;;  %v215_v3 = vrot.slane %v2105_v7, 3 }
 0x108   :  { %v198_v14 = vsel %vm193_vm12, %v195_v57, %v197_v10  ;;  %v225_v15 = vsel %vm220_vm13, %v222_v59, %v224_v11  ;;  %v206_v57 = vrot.slane %v2105_v7, 2  ;;  %v216_v44 = vsel %vm211_vm15, %v213_v60, %v215_v3  ;;  %v1433_v60 = vld [vmem:[%s3107_s2 + $0x298] sm:$0xff] }
 0x109   :  { %425 = vmatmul.f32.gmra.mxu3 %v198_v14  ;;  %521 = vmatmul.f32.gmra.mxu0 %v225_v15 }
 0x10a   :  { %v207_v61 = vsel %vm202_vm14, %v204_v49, %v206_v57  ;;  %v1435_v49 = vld [vmem:[%s3107_s2 + $0x2a8] sm:$0xff] }
 0x10b   :  { %v146_v17 = vpop.f32.mrf.mxu0  ;;  %v181_v18 = vpop.f32.mrf.mxu1 }
 0x10c   :  { %v2126_v19 = vadd.f32 %v181_v18, %v146_v17 }
 0x10e   :  { %v247_v22 = vrot.slane %v2126_v19, 4  ;;  %v232_v28 = vrot.slane %v2126_v19, 1  ;;  %v237_v59 = vrot.slane %v2126_v19, 2  ;;  %v242_v6 = vrot.slane %v2126_v19, 3 }
 0x110   :  { %v287_v23 = vsel %vm220_vm13, %v2105_v7, %v247_v22 }
 0x111   :  { %396 = vmatmul.f32.gmra.mxu2 %v287_v23  ;;  %v1442_v23 = vld [vmem:[%s3107_s2 + $0x2e0] sm:$0xff] }
 0x113   :  { %v149_v25 = vpop.f32.mrf.mxu0  ;;  %v184_v26 = vpop.f32.mrf.mxu1 }
 0x114   :  { %v2140_v27 = vadd.f32 %v184_v26, %v149_v25  ;;  %v1441_v25 = vld [vmem:[%s3107_s2 + $0x2d8] sm:$0xff]  ;;  %v1440_v26 = vld [vmem:[%s3107_s2 + $0x2d0] sm:$0xff] }
 0x116   :  { %v233_v29 = vrot.slane %v2140_v27, 1  ;;  %v248_v30 = vrot.slane %v2140_v27, 4  ;;  %v238_v58 = vrot.slane %v2140_v27, 2  ;;  %v243_v4 = vrot.slane %v2140_v27, 3  ;;  %v1477_v27 = vld [vmem:[%s3107_s2 + $0x3f8] sm:$0xff] }
 0x117   :  { %759 = vmatpush.msra.mxu2 %v1477_v27  ;;  %v1462_v27 = vld [vmem:[%s3107_s2 + $0x380] sm:$0xff] }
 0x118   :  { %v249_v31 = vsel %vm220_vm13, %v247_v22, %v248_v30  ;;  %v234_v32 = vsel %vm193_vm12, %v232_v28, %v233_v29  ;;  %v239_v63 = vsel %vm202_vm14, %v237_v59, %v238_v58  ;;  %v244_v9 = vsel %vm211_vm15, %v242_v6, %v243_v4  ;;  %v1443_v22 = vld [vmem:[%s3107_s2 + $0x2e8] sm:$0xff]  ;;  %v1493_v28 = vld [vmem:[%s3107_s2 + $0x478] sm:$0xff]  ;;  %v1484_v6 = vld [vmem:[%s3107_s2 + $0x430] sm:$0xff] }
 0x119   :  { %v255_v33 = vrot.slane %v249_v31, 4  ;;  %399 = vmatmul.f32.gmra.mxu2 %v249_v31  ;;  %v252_v34 = vrot.slane %v234_v32, 4  ;;  %v253_v1 = vrot.slane %v239_v63, 4  ;;  %703 = vmatpush.msrb.mxu1 %v1443_v22  ;;  %v1503_v59 = vld [vmem:[%s3107_s2 + $0x4c8] sm:$0xff]  ;;  %v1502_v63 = vld [vmem:[%s3107_s2 + $0x4c0] sm:$0xff] }
 0x11a   :  { %788 = vmatpush.msra.mxu3 %v1493_v28  ;;  %v1463_v22 = vld [vmem:[%s3107_s2 + $0x388] sm:$0xff]  ;;  %v1478_v28 = vld [vmem:[%s3107_s2 + $0x400] sm:$0xff] }
 0x11b   :  { %v152_v35 = vpop.f32.mrf.mxu0  ;;  %v187_v36 = vpop.f32.mrf.mxu1  ;;  %v288_v37 = vsel %vm220_vm13, %v197_v10, %v252_v34  ;;  %v291_v38 = vsel %vm220_vm13, %v224_v11, %v255_v33  ;;  %v289_v5 = vsel %vm220_vm13, %v206_v57, %v253_v1  ;;  %v254_v10 = vrot.slane %v244_v9, 4  ;;  %704 = vmatpush.msrb.mxu1 %v1442_v23  ;;  %v1487_v57 = vld [vmem:[%s3107_s2 + $0x448] sm:$0xff] }
 0x11c   :  { %v188_v39 = vadd.f32 %v187_v36, %v152_v35  ;;  %428 = vmatmul.f32.gmra.mxu3 %v288_v37  ;;  %524 = vmatmul.f32.gmra.mxu0 %v291_v38  ;;  %v1508_v35 = vld [vmem:[%s3107_s2 + $0x4f0] sm:$0xff]  ;;  %v1438_v36 = vld [vmem:[%s3107_s2 + $0x2c0] sm:$0xff]  ;;  %v1475_v37 = vld [vmem:[%s3107_s2 + $0x3e8] sm:$0xff] }
 0x11d   :  { %v290_v7 = vsel %vm220_vm13, %v215_v3, %v254_v10  ;;  %705 = vmatpush.msrb.mxu1 %v1441_v25  ;;  %v1491_v38 = vld [vmem:[%s3107_s2 + $0x468] sm:$0xff]  ;;  %v1485_v3 = vld [vmem:[%s3107_s2 + $0x438] sm:$0xff] }
 0x11e   :  { %v235_v40 = vrot.slane %v188_v39, 1  ;;  %v250_v41 = vrot.slane %v188_v39, 4  ;;  %v240_v2 = vrot.slane %v188_v39, 2  ;;  %v245_v11 = vrot.slane %v188_v39, 3  ;;  %v1507_v39 = vld [vmem:[%s3107_s2 + $0x4e8] sm:$0xff] }
 0x11f   :  { %706 = vmatpush.msrb.mxu1 %v1440_v26  ;;  %v1467_v9 = vld [vmem:[%s3107_s2 + $0x3a8] sm:$0xff] }
 0x120   :  { %v251_v42 = vsel %vm220_vm13, %v248_v30, %v250_v41  ;;  %v236_v43 = vsel %vm193_vm12, %v233_v29, %v235_v40  ;;  %v264_v51 = vrot.slane %v235_v40, 4  ;;  %v270_v52 = vrot.slane %v250_v41, 4  ;;  %v1509_v29 = vld [vmem:[%s3107_s2 + $0x4f8] sm:$0xff]  ;;  %v1439_v30 = vld [vmem:[%s3107_s2 + $0x2c8] sm:$0xff]  ;;  %v1474_v41 = vld [vmem:[%s3107_s2 + $0x3e0] sm:$0xff] }
 0x121   :  { %v262_v45 = vrot.slane %v251_v42, 4  ;;  %402 = vmatmul.f32.gmra.mxu2 %v251_v42  ;;  %v256_v46 = vrot.slane %v236_v43, 4  ;;  %v241_v54 = vsel %vm202_vm14, %v238_v58, %v240_v2  ;;  %v266_v13 = vrot.slane %v240_v2, 4  ;;  %817 = vmatpush.msra.mxu0 %v1509_v29  ;;  %v1437_v40 = vld [vmem:[%s3107_s2 + $0x2b8] sm:$0xff]  ;;  %v1490_v42 = vld [vmem:[%s3107_s2 + $0x460] sm:$0xff]  ;;  %v1479_v23 = vld [vmem:[%s3107_s2 + $0x408] sm:$0xff] }
 0x122   :  { %v258_v8 = vrot.slane %v241_v54, 4  ;;  %v246_v14 = vsel %vm211_vm15, %v243_v4, %v245_v11  ;;  %v268_v18 = vrot.slane %v245_v11, 4  ;;  %707 = vmatpush.msrb.mxu1 %v1439_v30  ;;  %v1506_v43 = vld [vmem:[%s3107_s2 + $0x4e0] sm:$0xff]  ;;  %v1469_v2 = vld [vmem:[%s3107_s2 + $0x3b8] sm:$0xff]  ;;  %v1468_v54 = vld [vmem:[%s3107_s2 + $0x3b0] sm:$0xff] }
 0x123   :  { %v257_v47 = vsel %vm220_vm13, %v252_v34, %v256_v46  ;;  %v263_v48 = vsel %vm220_vm13, %v255_v33, %v262_v45  ;;  %v265_v55 = vsel %vm220_vm13, %v256_v46, %v264_v51  ;;  %v271_v56 = vsel %vm220_vm13, %v262_v45, %v270_v52  ;;  %v1476_v33 = vld [vmem:[%s3107_s2 + $0x3f0] sm:$0xff]  ;;  %818 = vmatpush.msra.mxu0 %v1508_v35  ;;  %v1473_v46 = vld [vmem:[%s3107_s2 + $0x3d8] sm:$0xff]  ;;  %v1483_v11 = vld [vmem:[%s3107_s2 + $0x428] sm:$0xff] }
 0x124   :  { %431 = vmatmul.f32.gmra.mxu3 %v257_v47  ;;  %527 = vmatmul.f32.gmra.mxu0 %v263_v48  ;;  %v259_v12 = vsel %vm220_vm13, %v253_v1, %v258_v8  ;;  %v260_v15 = vrot.slane %v246_v14, 4  ;;  %v267_v16 = vsel %vm220_vm13, %v258_v8, %v266_v13  ;;  %v1492_v34 = vld [vmem:[%s3107_s2 + $0x470] sm:$0xff]  ;;  %v1489_v47 = vld [vmem:[%s3107_s2 + $0x458] sm:$0xff]  ;;  %v1430_v8 = vld [vmem:[%s3107_s2 + $0x280] sm:$0xff] }
 0x125   :  { %760 = vmatpush.msra.mxu2 %v1476_v33  ;;  %789 = vmatpush.msra.mxu3 %v1492_v34  ;;  %v1436_v45 = vld [vmem:[%s3107_s2 + $0x2b0] sm:$0xff]  ;;  %v1505_v48 = vld [vmem:[%s3107_s2 + $0x4d8] sm:$0xff]  ;;  %v1482_v13 = vld [vmem:[%s3107_s2 + $0x420] sm:$0xff] }
 0x126   :  { %v261_v17 = vsel %vm220_vm13, %v254_v10, %v260_v15  ;;  %v269_v19 = vsel %vm220_vm13, %v260_v15, %v268_v18  ;;  %708 = vmatpush.msrb.mxu1 %v1438_v36  ;;  %819 = vmatpush.msra.mxu0 %v1507_v39  ;;  %v1472_v51 = vld [vmem:[%s3107_s2 + $0x3d0] sm:$0xff]  ;;  %v1501_v4 = vld [vmem:[%s3107_s2 + $0x4b8] sm:$0xff]  ;;  %v1498_v14 = vld [vmem:[%s3107_s2 + $0x4a0] sm:$0xff] }
 0x127   :  { %761 = vmatpush.msra.mxu2 %v1475_v37  ;;  %790 = vmatpush.msra.mxu3 %v1491_v38  ;;  %v1488_v52 = vld [vmem:[%s3107_s2 + $0x450] sm:$0xff]  ;;  %v1497_v18 = vld [vmem:[%s3107_s2 + $0x498] sm:$0xff]  ;;  %v1495_v26 = vld [vmem:[%s3107_s2 + $0x488] sm:$0xff] }
 0x128   :  { %709 = vmatpush.msrb.mxu1 %v1437_v40  ;;  %820 = vmatpush.msra.mxu0 %v1506_v43  ;;  %v1494_v29 = vld [vmem:[%s3107_s2 + $0x480] sm:$0xff]  ;;  %v1461_v33 = vld [vmem:[%s3107_s2 + $0x378] sm:$0xff]  ;;  %v1460_v34 = vld [vmem:[%s3107_s2 + $0x370] sm:$0xff] }
 0x129   :  { %454 = vmatmul.f32.vlgmr.msrb.gmra.mxu2 %v205_v53  ;;  %791 = vmatpush.msra.mxu3 %v1490_v42  ;;  %v1504_v53 = vld [vmem:[%s3107_s2 + $0x4d0] sm:$0xff]  ;;  %v2398_v35 = vld [vmem:[%s3108_s3] ss:$0 sm:$0xff]  ;;  %v1459_v36 = vld [vmem:[%s3107_s2 + $0x368] sm:$0xff] }
 0x12a   :  { %762 = vmatpush.msra.mxu2 %v1474_v41  ;;  %710 = vmatpush.msrb.mxu1 %v1436_v45  ;;  %v1458_v39 = vld [vmem:[%s3107_s2 + $0x360] sm:$0xff]  ;;  %v1457_v42 = vld [vmem:[%s3107_s2 + $0x358] sm:$0xff]  ;;  %v1456_v43 = vld [vmem:[%s3107_s2 + $0x350] sm:$0xff] }
 0x12b   :  { %792 = vmatpush.msra.mxu3 %v1489_v47  ;;  %821 = vmatpush.msra.mxu0 %v1505_v48 }
 0x12c   :  { %434 = vmatmul.f32.gmra.mxu3 %v265_v55  ;;  %530 = vmatmul.f32.gmra.mxu0 %v271_v56  ;;  %v1434_v55 = vld [vmem:[%s3107_s2 + $0x2a0] sm:$0xff]  ;;  %v1471_v56 = vld [vmem:[%s3107_s2 + $0x3c8] sm:$0xff] }
 0x12d   :  { %763 = vmatpush.msra.mxu2 %v1473_v46  ;;  %711 = vmatpush.msrb.mxu1 %v1435_v49 }
 0x12e   :  { %793 = vmatpush.msra.mxu3 %v1488_v52  ;;  %822 = vmatpush.msra.mxu0 %v1504_v53 }
 0x12f   :  { %764 = vmatpush.msra.mxu2 %v1472_v51  ;;  %712 = vmatpush.msrb.mxu1 %v1434_v55  ;;  %v1454_v51 = vld [vmem:[%s3107_s2 + $0x340] sm:$0xff]  ;;  %v1453_v55 = vld [vmem:[%s3107_s2 + $0x338] sm:$0xff] }
 0x130   :  { %794 = vmatpush.msra.mxu3 %v1487_v57  ;;  %823 = vmatpush.msra.mxu0 %v1503_v59  ;;  %v1451_v59 = vld [vmem:[%s3107_s2 + $0x328] sm:$0xff] }
 0x131   :  { %457 = vmatmul.f32.gmra.mxu2 %v207_v61  ;;  %713 = vmatpush.msrb.mxu1 %v1433_v60  ;;  %v1470_v61 = vld [vmem:[%s3107_s2 + $0x3c0] sm:$0xff] }
 0x132   :  { %765 = vmatpush.msra.mxu2 %v1471_v56  ;;  %795 = vmatpush.msra.mxu3 %v1486_v62  ;;  %v1452_v56 = vld [vmem:[%s3107_s2 + $0x330] sm:$0xff]  ;;  %v1450_v62 = vld [vmem:[%s3107_s2 + $0x320] sm:$0xff] }
 0x133   :  { %824 = vmatpush.msra.mxu0 %v1502_v63 }
 0x134   :  { %486 = vmatmul.f32.vlgmr.msrb.gmra.mxu3 %v214_v0  ;;  %766 = vmatpush.msra.mxu2 %v1470_v61  ;;  %v1432_v0 = vld [vmem:[%s3107_s2 + $0x290] sm:$0xff] }
 0x135   :  { %714 = vmatpush.msrb.mxu1 %v1432_v0  ;;  %796 = vmatpush.msra.mxu3 %v1485_v3 }
 0x136   :  { %767 = vmatpush.msra.mxu2 %v1469_v2  ;;  %825 = vmatpush.msra.mxu0 %v1501_v4  ;;  %v1449_v2 = vld [vmem:[%s3107_s2 + $0x318] sm:$0xff] }
 0x137   :  { %797 = vmatpush.msra.mxu3 %v1484_v6 }
 0x138   :  { %768 = vmatpush.msra.mxu2 %v1468_v54 }
 0x139   :  { %460 = vmatmul.f32.gmra.mxu2 %v289_v5  ;;  %v1431_v5 = vld [vmem:[%s3107_s2 + $0x288] sm:$0xff]  ;;  %798 = vmatpush.msra.mxu3 %v1483_v11 }
 0x13a   :  { %715 = vmatpush.msrb.mxu1 %v1431_v5  ;;  %769 = vmatpush.msra.mxu2 %v1467_v9  ;;  %v1448_v5 = vld [vmem:[%s3107_s2 + $0x310] sm:$0xff] }
 0x13b   :  { %799 = vmatpush.msra.mxu3 %v1482_v13 }
 0x13c   :  { %489 = vmatmul.f32.gmra.mxu3 %v216_v44  ;;  %v1500_v44 = vld [vmem:[%s3107_s2 + $0x4b0] sm:$0xff]  ;;  %716 = vmatpush.msrb.mxu1 %v1430_v8 }
 0x13d   :  { %826 = vmatpush.msra.mxu0 %v1500_v44 }
 0x13e   :  { %730 = vmatpush.msra.mxu1 %v1461_v33 }
 0x140   :  { %731 = vmatpush.msra.mxu1 %v1460_v34 }
 0x141   :  { %463 = vmatmul.f32.gmra.mxu2 %v259_v12  ;;  %v1499_v12 = vld [vmem:[%s3107_s2 + $0x4a8] sm:$0xff] }
 0x142   :  { %827 = vmatpush.msra.mxu0 %v1499_v12  ;;  %732 = vmatpush.msra.mxu1 %v1459_v36 }
 0x144   :  { %492 = vmatmul.f32.gmra.mxu3 %v290_v7  ;;  %v1466_v7 = vld [vmem:[%s3107_s2 + $0x3a0] sm:$0xff]  ;;  %828 = vmatpush.msra.mxu0 %v1498_v14 }
 0x145   :  { %770 = vmatpush.msra.mxu2 %v1466_v7  ;;  %733 = vmatpush.msra.mxu1 %v1458_v39  ;;  %v1447_v7 = vld [vmem:[%s3107_s2 + $0x308] sm:$0xff] }
 0x146   :  { %829 = vmatpush.msra.mxu0 %v1497_v18 }
 0x147   :  { %734 = vmatpush.msra.mxu1 %v1457_v42 }
 0x148   :  { %830 = vmatpush.msra.mxu0 %v1496_v21 }
 0x149   :  { %466 = vmatmul.f32.gmra.mxu2 %v267_v16  ;;  %v1465_v16 = vld [vmem:[%s3107_s2 + $0x398] sm:$0xff]  ;;  %735 = vmatpush.msra.mxu1 %v1456_v43 }
 0x14a   :  { %771 = vmatpush.msra.mxu2 %v1465_v16  ;;  %831 = vmatpush.msra.mxu0 %v1495_v26 }
 0x14c   :  { %495 = vmatmul.f32.gmra.mxu3 %v261_v17  ;;  %v1481_v17 = vld [vmem:[%s3107_s2 + $0x418] sm:$0xff]  ;;  %832 = vmatpush.msra.mxu0 %v1494_v29 }
 0x14d   :  { %800 = vmatpush.msra.mxu3 %v1481_v17 }
 0x14f   :  { %801 = vmatpush.msra.mxu3 %v1480_v20 }
 0x151   :  { %802 = vmatpush.msra.mxu3 %v1479_v23 }
 0x153   :  { %803 = vmatpush.msra.mxu3 %v1478_v28 }
 0x154   :  { %498 = vmatmul.f32.gmra.mxu3 %v269_v19  ;;  %v1464_v19 = vld [vmem:[%s3107_s2 + $0x390] sm:$0xff] }
 0x155   :  { %772 = vmatpush.msra.mxu2 %v1464_v19  ;;  %v1446_v19 = vld [vmem:[%s3107_s2 + $0x300] sm:$0xff] }
 0x157   :  { %773 = vmatpush.msra.mxu2 %v1463_v22 }
 0x159   :  { %774 = vmatpush.msra.mxu2 %v1462_v27 }
 0x179   :  { %v2191_v24 = vpop.f32.mrf.mxu2 }
 0x17a   :  { %v392_v38 = vadd.f32 %v2398_v35, %v2191_v24  ;;  %v1455_v24 = vld [vmem:[%s3107_s2 + $0x348] sm:$0xff] }
 0x17b   :  { %736 = vmatpush.msra.mxu1 %v1455_v24 }
 0x17d   :  { %737 = vmatpush.msra.mxu1 %v1454_v51 }
 0x17e   :  { %v519_v40 = vpop.f32.mrf.mxu0 }
 0x17f   :  { %738 = vmatpush.msra.mxu1 %v1453_v55 }
 0x181   :  { %v2211_v31 = vpop.f32.mrf.mxu2  ;;  %739 = vmatpush.msra.mxu1 %v1452_v56 }
 0x183   :  { %740 = vmatpush.msra.mxu1 %v1451_v59 }
 0x184   :  { %v2213_v32 = vpop.f32.mrf.mxu3 }
 0x185   :  { %v424_v41 = vadd.f32 %v2213_v32, %v392_v38  ;;  %v395_v32 = vadd.f32 %v2398_v35, %v2211_v31  ;;  %741 = vmatpush.msra.mxu1 %v1450_v62 }
 0x186   :  { %v522_v57 = vpop.f32.mrf.mxu0 }
 0x187   :  { %742 = vmatpush.msra.mxu1 %v1449_v2 }
 0x189   :  { %743 = vmatpush.msra.mxu1 %v1448_v5 }
 0x18b   :  { %744 = vmatpush.msra.mxu1 %v1447_v7 }
 0x18c   :  { %v2283_v58 = vpop.f32.mrf.mxu3 }
 0x18d   :  { %v427_v52 = vadd.f32 %v2283_v58, %v395_v32  ;;  %745 = vmatpush.msra.mxu1 %v1446_v19 }
 0x194   :  { %v2263_v50 = vpop.f32.mrf.mxu2 }
 0x195   :  { %v398_v63 = vadd.f32 %v2398_v35, %v2263_v50 }
 0x199   :  { %v525_v54 = vpop.f32.mrf.mxu0 }
 0x19c   :  { %v2303_v1 = vpop.f32.mrf.mxu2 }
 0x19d   :  { %v401_v20 = vadd.f32 %v2398_v35, %v2303_v1 }
 0x19f   :  { %v2332_v10 = vpop.f32.mrf.mxu3 }
 0x1a0   :  { %v430_v3 = vadd.f32 %v2332_v10, %v398_v63 }
 0x1a4   :  { %v2349_v15 = vpop.f32.mrf.mxu2 }
 0x1a7   :  { %v2375_v25 = vpop.f32.mrf.mxu3 }
 0x1a8   :  { %v433_v22 = vadd.f32 %v2375_v25, %v401_v20  ;;  %v404_v25 = vadd.f32 %v2398_v35, %v2349_v15 }
 0x1ac   :  { %v455_v30 = vpop.f32.mrf.mxu2 }
 0x1ad   :  { %v456_v46 = vadd.f32 %v455_v30, %v424_v41  ;;  %v528_v30 = vpop.f32.mrf.mxu0 }
 0x1af   :  { %v2403_v37 = vpop.f32.mrf.mxu3 }
 0x1b0   :  { %v436_v41 = vadd.f32 %v2403_v37, %v404_v25  ;;  %v1572_v25 = vld [vmem:[%s3107_s2 + $0x6f0] sm:$0xff] }
 0x1b4   :  { %v458_v45 = vpop.f32.mrf.mxu2 }
 0x1b5   :  { %v459_v31 = vadd.f32 %v458_v45, %v427_v52  ;;  %v531_v32 = vpop.f32.mrf.mxu0 }
 0x1b7   :  { %v487_v47 = vpop.f32.mrf.mxu3 }
 0x1b8   :  { %v488_v48 = vadd.f32 %v487_v47, %v456_v46 }
 0x1ba   :  { %v520_v49 = vadd.f32 %v519_v40, %v488_v48 }
 0x1bc   :  { %v2426_v53 = vmax.f32 %v520_v49, 0.0  ;;  %v461_v58 = vpop.f32.mrf.mxu2 }
 0x1bd   :  { %v462_v6 = vadd.f32 %v461_v58, %v430_v3 }
 0x1be   :  { %717 = vmatmul.f32.vlgmr.msrb.gmra.mxu1 %v2426_v53  ;;  %v549_v44 = vrot.slane %v2426_v53, 2  ;;  %v556_v50 = vrot.slane %v2426_v53, 3  ;;  %v563_v10 = vrot.slane %v2426_v53, 4 }
 0x1bf   :  { %v490_v60 = vpop.f32.mrf.mxu3 }
 0x1c0   :  { %v491_v61 = vadd.f32 %v490_v60, %v459_v31 }
 0x1c2   :  { %v523_v0 = vadd.f32 %v522_v57, %v491_v61 }
 0x1c4   :  { %v2447_v4 = vmax.f32 %v523_v0, 0.0  ;;  %v464_v18 = vpop.f32.mrf.mxu2 }
 0x1c5   :  { %v465_v26 = vadd.f32 %v464_v18, %v433_v22  ;;  %v1525_v22 = vld [vmem:[%s3107_s2 + $0x578] sm:$0xff] }
 0x1c6   :  { %720 = vmatmul.f32.gmra.mxu1 %v2447_v4  ;;  %v550_v8 = vrot.slane %v2447_v4, 2  ;;  %v557_v9 = vrot.slane %v2447_v4, 3  ;;  %v564_v11 = vrot.slane %v2447_v4, 4 }
 0x1c7   :  { %v493_v12 = vpop.f32.mrf.mxu3  ;;  %996 = vmatpush.msrb.mxu1 %v1525_v22  ;;  %v1543_v22 = vld [vmem:[%s3107_s2 + $0x608] sm:$0xff] }
 0x1c8   :  { %v494_v13 = vadd.f32 %v493_v12, %v462_v6  ;;  %v551_v14 = vsel %vm202_vm14, %v549_v44, %v550_v8  ;;  %v558_v16 = vsel %vm211_vm15, %v556_v50, %v557_v9  ;;  %v565_v17 = vsel %vm220_vm13, %v563_v10, %v564_v11 }
 0x1c9   :  { %775 = vmatmul.f32.vlgmr.msra.gmra.mxu2 %v551_v14  ;;  %804 = vmatmul.f32.vlgmr.msra.gmra.mxu3 %v558_v16  ;;  %v542_v6 = vrot.slane %v2426_v53, 1 }
 0x1ca   :  { %v526_v21 = vadd.f32 %v525_v54, %v494_v13  ;;  %833 = vmatmul.f32.vlgmr.msra.gmra.mxu0 %v565_v17  ;;  %v543_v54 = vrot.slane %v2447_v4, 1 }
 0x1cc   :  { %v2471_v23 = vmax.f32 %v526_v21, 0.0  ;;  %v467_v40 = vpop.f32.mrf.mxu2 }
 0x1cd   :  { %v468_v43 = vadd.f32 %v467_v40, %v436_v41  ;;  %v1539_v40 = vld [vmem:[%s3107_s2 + $0x5e8] sm:$0xff] }
 0x1ce   :  { %v552_v27 = vrot.slane %v2471_v23, 2  ;;  %v559_v28 = vrot.slane %v2471_v23, 3  ;;  %v566_v29 = vrot.slane %v2471_v23, 4  ;;  %v545_v7 = vrot.slane %v2471_v23, 1  ;;  %v1524_v23 = vld [vmem:[%s3107_s2 + $0x570] sm:$0xff]  ;;  %v1555_v41 = vld [vmem:[%s3107_s2 + $0x668] sm:$0xff] }
 0x1cf   :  { %v496_v33 = vpop.f32.mrf.mxu3  ;;  %997 = vmatpush.msrb.mxu1 %v1524_v23  ;;  %v1559_v23 = vld [vmem:[%s3107_s2 + $0x688] sm:$0xff] }
 0x1d0   :  { %v497_v34 = vadd.f32 %v496_v33, %v465_v26  ;;  %v553_v1 = vsel %vm202_vm14, %v550_v8, %v552_v27  ;;  %v560_v36 = vsel %vm211_vm15, %v557_v9, %v559_v28  ;;  %v567_v38 = vsel %vm220_vm13, %v564_v11, %v566_v29  ;;  %v1523_v26 = vld [vmem:[%s3107_s2 + $0x568] sm:$0xff]  ;;  %v1573_v33 = vld [vmem:[%s3107_s2 + $0x6f8] sm:$0xff] }
 0x1d1   :  { %778 = vmatmul.f32.gmra.mxu2 %v553_v1  ;;  %807 = vmatmul.f32.gmra.mxu3 %v560_v36  ;;  %v544_v8 = vsel %vm193_vm12, %v542_v6, %v543_v54  ;;  %v546_v53 = vsel %vm193_vm12, %v543_v54, %v545_v7  ;;  %v1519_v1 = vld [vmem:[%s3107_s2 + $0x548] sm:$0xff]  ;;  %v1540_v36 = vld [vmem:[%s3107_s2 + $0x5f0] sm:$0xff] }
 0x1d2   :  { %v529_v39 = vadd.f32 %v528_v30, %v497_v34  ;;  %836 = vmatmul.f32.gmra.mxu0 %v567_v38  ;;  %998 = vmatpush.msrb.mxu1 %v1523_v26  ;;  %v1521_v30 = vld [vmem:[%s3107_s2 + $0x558] sm:$0xff]  ;;  %v1520_v34 = vld [vmem:[%s3107_s2 + $0x550] sm:$0xff]  ;;  %v1587_v26 = vld [vmem:[%s3107_s2 + $0x768] sm:$0xff] }
 0x1d3   :  { %1074 = vmatpush.msrb.mxu0 %v1573_v33  ;;  %v1556_v38 = vld [vmem:[%s3107_s2 + $0x670] sm:$0xff]  ;;  %v1586_v33 = vld [vmem:[%s3107_s2 + $0x760] sm:$0xff] }
 0x1d4   :  { %v537_v42 = vmax.f32 %v529_v39, 0.0  ;;  %v1518_v39 = vld [vmem:[%s3107_s2 + $0x540] sm:$0xff]  ;;  %v1532_v54 = vld [vmem:[%s3107_s2 + $0x5b0] sm:$0xff] }
 0x1d5   :  { %1075 = vmatpush.msrb.mxu0 %v1572_v25  ;;  %v1548_v6 = vld [vmem:[%s3107_s2 + $0x630] sm:$0xff] }
 0x1d6   :  { %v584_v45 = vrot.slane %v537_v42, 4  ;;  %v576_v48 = vrot.slane %v537_v42, 2  ;;  %v580_v49 = vrot.slane %v537_v42, 3  ;;  %v572_v13 = vrot.slane %v537_v42, 1  ;;  %v1571_v42 = vld [vmem:[%s3107_s2 + $0x6e8] sm:$0xff] }
 0x1d7   :  { %v499_v46 = vpop.f32.mrf.mxu3  ;;  %1076 = vmatpush.msrb.mxu0 %v1571_v42 }
 0x1d8   :  { %v500_v24 = vadd.f32 %v499_v46, %v468_v43  ;;  %v587_v47 = vsel %vm220_vm13, %v566_v29, %v584_v45  ;;  %v577_v15 = vsel %vm202_vm14, %v552_v27, %v576_v48  ;;  %v581_v35 = vsel %vm211_vm15, %v559_v28, %v580_v49  ;;  %v1522_v27 = vld [vmem:[%s3107_s2 + $0x560] sm:$0xff]  ;;  %v1541_v28 = vld [vmem:[%s3107_s2 + $0x5f8] sm:$0xff] }
 0x1d9   :  { %723 = vmatmul.f32.gmra.mxu1 %v587_v47  ;;  %v591_v57 = vrot.slane %v577_v15, 4  ;;  %v594_v60 = vrot.slane %v581_v35, 4  ;;  %v597_v0 = vrot.slane %v584_v45, 4  ;;  %v573_v16 = vsel %vm193_vm12, %v545_v7, %v572_v13  ;;  %v1557_v29 = vld [vmem:[%s3107_s2 + $0x678] sm:$0xff]  ;;  %1022 = vmatpush.msrb.mxu2 %v1541_v28  ;;  %v1554_v46 = vld [vmem:[%s3107_s2 + $0x660] sm:$0xff]  ;;  %v1536_v15 = vld [vmem:[%s3107_s2 + $0x5d0] sm:$0xff] }
 0x1da   :  { %v532_v51 = vadd.f32 %v531_v32, %v500_v24  ;;  %v588_v18 = vrot.slane %v573_v16, 4  ;;  %1048 = vmatpush.msrb.mxu3 %v1557_v29  ;;  %999 = vmatpush.msrb.mxu1 %v1522_v27  ;;  %v1517_v43 = vld [vmem:[%s3107_s2 + $0x538] sm:$0xff]  ;;  %v1570_v47 = vld [vmem:[%s3107_s2 + $0x6e0] sm:$0xff]  ;;  %v1552_v35 = vld [vmem:[%s3107_s2 + $0x650] sm:$0xff] }
 0x1db   :  { %1023 = vmatpush.msrb.mxu2 %v1540_v36  ;;  %v1537_v32 = vld [vmem:[%s3107_s2 + $0x5d8] sm:$0xff]  ;;  %1077 = vmatpush.msrb.mxu0 %v1570_v47  ;;  %v1562_v7 = vld [vmem:[%s3107_s2 + $0x6a0] sm:$0xff]  ;;  %v1584_v36 = vld [vmem:[%s3107_s2 + $0x750] sm:$0xff] }
 0x1dc   :  { %v538_v52 = vmax.f32 %v532_v51, 0.0  ;;  %1000 = vmatpush.msrb.mxu1 %v1521_v30  ;;  %1049 = vmatpush.msrb.mxu3 %v1556_v38  ;;  %v1569_v51 = vld [vmem:[%s3107_s2 + $0x6d8] sm:$0xff]  ;;  %v1526_v27 = vld [vmem:[%s3107_s2 + $0x580] sm:$0xff]  ;;  %v1583_v38 = vld [vmem:[%s3107_s2 + $0x748] sm:$0xff] }
 0x1dd   :  { %1024 = vmatpush.msrb.mxu2 %v1539_v40  ;;  %1078 = vmatpush.msrb.mxu0 %v1569_v51  ;;  %v1589_v16 = vld [vmem:[%s3107_s2 + $0x778] sm:$0xff]  ;;  %v1542_v28 = vld [vmem:[%s3107_s2 + $0x600] sm:$0xff]  ;;  %v1580_v47 = vld [vmem:[%s3107_s2 + $0x730] sm:$0xff] }
 0x1de   :  { %v585_v55 = vrot.slane %v538_v52, 4  ;;  %v578_v56 = vrot.slane %v538_v52, 2  ;;  %v582_v37 = vrot.slane %v538_v52, 3  ;;  %v574_v4 = vrot.slane %v538_v52, 1  ;;  %1001 = vmatpush.msrb.mxu1 %v1520_v34  ;;  %1050 = vmatpush.msrb.mxu3 %v1555_v41  ;;  %v1515_v52 = vld [vmem:[%s3107_s2 + $0x528] sm:$0xff]  ;;  %v1558_v29 = vld [vmem:[%s3107_s2 + $0x680] sm:$0xff] }
 0x1df   :  { %v1585_v34 = vld [vmem:[%s3107_s2 + $0x758] sm:$0xff]  ;;  %v1582_v40 = vld [vmem:[%s3107_s2 + $0x740] sm:$0xff] }
 0x1e0   :  { %v586_v31 = vsel %vm220_vm13, %v584_v45, %v585_v55  ;;  %v579_v59 = vsel %vm202_vm14, %v576_v48, %v578_v56  ;;  %v583_v58 = vsel %vm211_vm15, %v580_v49, %v582_v37  ;;  %v602_v44 = vrot.slane %v578_v56, 4  ;;  %1002 = vmatpush.msrb.mxu1 %v1519_v1  ;;  %v1538_v45 = vld [vmem:[%s3107_s2 + $0x5e0] sm:$0xff]  ;;  %v1516_v48 = vld [vmem:[%s3107_s2 + $0x530] sm:$0xff]  ;;  %1051 = vmatpush.msrb.mxu3 %v1554_v46  ;;  %v1553_v49 = vld [vmem:[%s3107_s2 + $0x658] sm:$0xff] }
 0x1e1   :  { %v598_v61 = vrot.slane %v586_v31, 4  ;;  %726 = vmatmul.f32.gmra.mxu1 %v586_v31  ;;  %v592_v62 = vrot.slane %v579_v59, 4  ;;  %v595_v63 = vrot.slane %v583_v58, 4  ;;  %v604_v50 = vrot.slane %v582_v37, 4  ;;  %1025 = vmatpush.msrb.mxu2 %v1538_v45  ;;  %v1514_v56 = vld [vmem:[%s3107_s2 + $0x520] sm:$0xff]  ;;  %v1535_v37 = vld [vmem:[%s3107_s2 + $0x5c8] sm:$0xff] }
 0x1e2   :  { %v606_v9 = vrot.slane %v585_v55, 4  ;;  %v575_v14 = vsel %vm193_vm12, %v572_v13, %v574_v4  ;;  %v600_v20 = vrot.slane %v574_v4, 4  ;;  %1003 = vmatpush.msrb.mxu1 %v1518_v39  ;;  %1052 = vmatpush.msrb.mxu3 %v1553_v49  ;;  %v1568_v55 = vld [vmem:[%s3107_s2 + $0x6d0] sm:$0xff]  ;;  %v1567_v31 = vld [vmem:[%s3107_s2 + $0x6c8] sm:$0xff]  ;;  %v1513_v59 = vld [vmem:[%s3107_s2 + $0x518] sm:$0xff] }
 0x1e3   :  { %v593_v2 = vsel %vm220_vm13, %v591_v57, %v592_v62  ;;  %v596_v3 = vsel %vm220_vm13, %v594_v60, %v595_v63  ;;  %v599_v5 = vsel %vm220_vm13, %v597_v0, %v598_v61  ;;  %v603_v10 = vsel %vm220_vm13, %v592_v62, %v602_v44  ;;  %1026 = vmatpush.msrb.mxu2 %v1537_v32  ;;  %v1551_v57 = vld [vmem:[%s3107_s2 + $0x648] sm:$0xff]  ;;  %v1534_v58 = vld [vmem:[%s3107_s2 + $0x5c0] sm:$0xff]  ;;  %v1533_v0 = vld [vmem:[%s3107_s2 + $0x5b8] sm:$0xff] }
 0x1e4   :  { %781 = vmatmul.f32.gmra.mxu2 %v593_v2  ;;  %810 = vmatmul.f32.gmra.mxu3 %v596_v3  ;;  %v605_v11 = vsel %vm220_vm13, %v595_v63, %v604_v50  ;;  %v607_v12 = vsel %vm220_vm13, %v598_v61, %v606_v9  ;;  %v589_v17 = vrot.slane %v575_v14, 4  ;;  %v1550_v60 = vld [vmem:[%s3107_s2 + $0x640] sm:$0xff]  ;;  %v1512_v63 = vld [vmem:[%s3107_s2 + $0x510] sm:$0xff]  ;;  %v1549_v2 = vld [vmem:[%s3107_s2 + $0x638] sm:$0xff] }
 0x1e5   :  { %839 = vmatmul.f32.gmra.mxu0 %v599_v5  ;;  %1004 = vmatpush.msrb.mxu1 %v1517_v43  ;;  %v1566_v61 = vld [vmem:[%s3107_s2 + $0x6c0] sm:$0xff]  ;;  %v1565_v3 = vld [vmem:[%s3107_s2 + $0x6b8] sm:$0xff]  ;;  %v1511_v5 = vld [vmem:[%s3107_s2 + $0x508] sm:$0xff] }
 0x1e6   :  { %v590_v19 = vsel %vm220_vm13, %v588_v18, %v589_v17  ;;  %v601_v21 = vsel %vm220_vm13, %v589_v17, %v600_v20  ;;  %1027 = vmatpush.msrb.mxu2 %v1536_v15  ;;  %1053 = vmatpush.msrb.mxu3 %v1552_v35  ;;  %v1564_v44 = vld [vmem:[%s3107_s2 + $0x6b0] sm:$0xff]  ;;  %v1510_v50 = vld [vmem:[%s3107_s2 + $0x500] sm:$0xff]  ;;  %v1547_v9 = vld [vmem:[%s3107_s2 + $0x628] sm:$0xff] }
 0x1e7   :  { %1005 = vmatpush.msrb.mxu1 %v1516_v48  ;;  %1079 = vmatpush.msrb.mxu0 %v1568_v55  ;;  %v1529_v13 = vld [vmem:[%s3107_s2 + $0x598] sm:$0xff]  ;;  %v1528_v17 = vld [vmem:[%s3107_s2 + $0x590] sm:$0xff]  ;;  %v2721_v1 = vld [vmem:[%s3108_s3 + $0x1] ss:$0 sm:$0xff] }
 0x1e8   :  { %1028 = vmatpush.msrb.mxu2 %v1535_v37  ;;  %1054 = vmatpush.msrb.mxu3 %v1551_v57  ;;  %v1561_v14 = vld [vmem:[%s3107_s2 + $0x698] sm:$0xff]  ;;  %v1544_v18 = vld [vmem:[%s3107_s2 + $0x610] sm:$0xff]  ;;  %v1578_v49 = vld [vmem:[%s3107_s2 + $0x720] sm:$0xff] }
 0x1e9   :  { %746 = vmatmul.f32.vlgmr.msra.gmra.mxu1 %v544_v8  ;;  %1080 = vmatpush.msrb.mxu0 %v1567_v31  ;;  %v1531_v8 = vld [vmem:[%s3107_s2 + $0x5a8] sm:$0xff]  ;;  %v1588_v20 = vld [vmem:[%s3107_s2 + $0x770] sm:$0xff]  ;;  %v1581_v45 = vld [vmem:[%s3107_s2 + $0x738] sm:$0xff] }
 0x1ea   :  { %1006 = vmatpush.msrb.mxu1 %v1515_v52  ;;  %1029 = vmatpush.msrb.mxu2 %v1534_v58  ;;  %v1577_v37 = vld [vmem:[%s3107_s2 + $0x718] sm:$0xff] }
 0x1eb   :  { %1055 = vmatpush.msrb.mxu3 %v1550_v60  ;;  %1081 = vmatpush.msrb.mxu0 %v1566_v61  ;;  %v1575_v61 = vld [vmem:[%s3107_s2 + $0x708] sm:$0xff] }
 0x1ec   :  { %784 = vmatmul.f32.gmra.mxu2 %v603_v10  ;;  %813 = vmatmul.f32.gmra.mxu3 %v605_v11  ;;  %v1563_v10 = vld [vmem:[%s3107_s2 + $0x6a8] sm:$0xff]  ;;  %v1530_v11 = vld [vmem:[%s3107_s2 + $0x5a0] sm:$0xff] }
 0x1ed   :  { %842 = vmatmul.f32.gmra.mxu0 %v607_v12  ;;  %1007 = vmatpush.msrb.mxu1 %v1514_v56  ;;  %v1546_v12 = vld [vmem:[%s3107_s2 + $0x620] sm:$0xff] }
 0x1ee   :  { %1030 = vmatpush.msrb.mxu2 %v1533_v0  ;;  %1056 = vmatpush.msrb.mxu3 %v1549_v2  ;;  %v1574_v0 = vld [vmem:[%s3107_s2 + $0x700] sm:$0xff] }
 0x1ef   :  { %1008 = vmatpush.msrb.mxu1 %v1513_v59  ;;  %1082 = vmatpush.msrb.mxu0 %v1565_v3  ;;  %v1576_v59 = vld [vmem:[%s3107_s2 + $0x710] sm:$0xff] }
 0x1f0   :  { %1031 = vmatpush.msrb.mxu2 %v1532_v54  ;;  %1057 = vmatpush.msrb.mxu3 %v1548_v6 }
 0x1f1   :  { %749 = vmatmul.f32.gmra.mxu1 %v546_v53  ;;  %1083 = vmatpush.msrb.mxu0 %v1564_v44  ;;  %v1545_v53 = vld [vmem:[%s3107_s2 + $0x618] sm:$0xff] }
 0x1f2   :  { %1009 = vmatpush.msrb.mxu1 %v1512_v63  ;;  %1032 = vmatpush.msrb.mxu2 %v1531_v8 }
 0x1f3   :  { %1058 = vmatpush.msrb.mxu3 %v1547_v9  ;;  %1084 = vmatpush.msrb.mxu0 %v1563_v10 }
 0x1f4   :  { %1010 = vmatpush.msrb.mxu1 %v1511_v5  ;;  %1033 = vmatpush.msrb.mxu2 %v1530_v11 }
 0x1f5   :  { %1059 = vmatpush.msrb.mxu3 %v1546_v12  ;;  %1085 = vmatpush.msrb.mxu0 %v1562_v7 }
 0x1f6   :  { %1011 = vmatpush.msrb.mxu1 %v1510_v50  ;;  %1034 = vmatpush.msrb.mxu2 %v1529_v13 }
 0x1f7   :  { %1060 = vmatpush.msrb.mxu3 %v1545_v53  ;;  %1086 = vmatpush.msrb.mxu0 %v1561_v14 }
 0x1f8   :  { %1100 = vmatpush.msra.mxu1 %v1589_v16  ;;  %1035 = vmatpush.msrb.mxu2 %v1528_v17 }
 0x1f9   :  { %752 = vmatmul.f32.gmra.mxu1 %v590_v19  ;;  %v1560_v19 = vld [vmem:[%s3107_s2 + $0x690] sm:$0xff]  ;;  %1061 = vmatpush.msrb.mxu3 %v1544_v18 }
 0x1fa   :  { %1087 = vmatpush.msrb.mxu0 %v1560_v19  ;;  %1101 = vmatpush.msra.mxu1 %v1588_v20 }
 0x1fb   :  { %1062 = vmatpush.msrb.mxu3 %v1543_v22 }
 0x1fc   :  { %1088 = vmatpush.msrb.mxu0 %v1559_v23  ;;  %1102 = vmatpush.msra.mxu1 %v1587_v26 }
 0x1fd   :  { %1063 = vmatpush.msrb.mxu3 %v1542_v28 }
 0x1fe   :  { %1089 = vmatpush.msrb.mxu0 %v1558_v29  ;;  %1103 = vmatpush.msra.mxu1 %v1586_v33 }
 0x200   :  { %1104 = vmatpush.msra.mxu1 %v1585_v34 }
 0x201   :  { %755 = vmatmul.f32.gmra.mxu1 %v601_v21  ;;  %v1527_v21 = vld [vmem:[%s3107_s2 + $0x588] sm:$0xff] }
 0x202   :  { %1036 = vmatpush.msrb.mxu2 %v1527_v21  ;;  %1105 = vmatpush.msra.mxu1 %v1584_v36 }
 0x204   :  { %1037 = vmatpush.msrb.mxu2 %v1526_v27  ;;  %1106 = vmatpush.msra.mxu1 %v1583_v38 }
 0x206   :  { %1107 = vmatpush.msra.mxu1 %v1582_v40 }
 0x208   :  { %1108 = vmatpush.msra.mxu1 %v1581_v45 }
 0x20a   :  { %1109 = vmatpush.msra.mxu1 %v1580_v47 }
 0x23b   :  { %v2563_v24 = vpop.f32.mrf.mxu1 }
 0x23c   :  { %v719_v39 = vadd.f32 %v2721_v1, %v2563_v24  ;;  %v1579_v24 = vld [vmem:[%s3107_s2 + $0x728] sm:$0xff] }
 0x23d   :  { %1110 = vmatpush.msra.mxu1 %v1579_v24 }
 0x23f   :  { %1111 = vmatpush.msra.mxu1 %v1578_v49 }
 0x241   :  { %1112 = vmatpush.msra.mxu1 %v1577_v37 }
 0x243   :  { %v2616_v62 = vpop.f32.mrf.mxu1  ;;  %1113 = vmatpush.msra.mxu1 %v1576_v59 }
 0x244   :  { %v722_v51 = vadd.f32 %v2721_v1, %v2616_v62 }
 0x245   :  { %1114 = vmatpush.msra.mxu1 %v1575_v61 }
 0x247   :  { %v834_v46 = vpop.f32.mrf.mxu0  ;;  %1115 = vmatpush.msra.mxu1 %v1574_v0  ;;  %v1621_v0 = vld [vmem:[%s3107_s2 + $0x878] sm:$0xff] }
 0x248   :  { %1278 = vmatpush.msra.mxu3 %v1621_v0  ;;  %v1664_v0 = vld [vmem:[%s3107_s2 + $0x9d0] sm:$0xff] }
 0x24c   :  { %v776_v25 = vpop.f32.mrf.mxu2  ;;  %v805_v41 = vpop.f32.mrf.mxu3 }
 0x24f   :  { %v837_v58 = vpop.f32.mrf.mxu0 }
 0x254   :  { %v779_v15 = vpop.f32.mrf.mxu2  ;;  %v808_v57 = vpop.f32.mrf.mxu3 }
 0x256   :  { %v2663_v4 = vpop.f32.mrf.mxu1 }
 0x257   :  { %v725_v62 = vadd.f32 %v2721_v1, %v2663_v4 }
 0x25e   :  { %v2710_v30 = vpop.f32.mrf.mxu1 }
 0x25f   :  { %v728_v16 = vadd.f32 %v2721_v1, %v2710_v30 }
 0x262   :  { %v840_v7 = vpop.f32.mrf.mxu0 }
 0x266   :  { %v747_v42 = vpop.f32.mrf.mxu1 }
 0x267   :  { %v748_v43 = vadd.f32 %v747_v42, %v719_v39  ;;  %v782_v2 = vpop.f32.mrf.mxu2  ;;  %v811_v6 = vpop.f32.mrf.mxu3 }
 0x269   :  { %v777_v48 = vadd.f32 %v776_v25, %v748_v43 }
 0x26a   :  { %v843_v29 = vpop.f32.mrf.mxu0 }
 0x26b   :  { %v806_v32 = vadd.f32 %v805_v41, %v777_v48 }
 0x26d   :  { %v835_v52 = vadd.f32 %v834_v46, %v806_v32 }
 0x26e   :  { %v750_v35 = vpop.f32.mrf.mxu1 }
 0x26f   :  { %v2748_v55 = vmax.f32 %v835_v52, 0.0  ;;  %v751_v56 = vadd.f32 %v750_v35, %v722_v51  ;;  %v785_v21 = vpop.f32.mrf.mxu2  ;;  %v814_v26 = vpop.f32.mrf.mxu3 }
 0x271   :  { %v780_v31 = vadd.f32 %v779_v15, %v751_v56  ;;  %1012 = vmatmul.f32.vlgmr.msrb.gmra.mxu1 %v2748_v55  ;;  %v852_v44 = vrot.slane %v2748_v55, 1  ;;  %v857_v50 = vrot.slane %v2748_v55, 2  ;;  %v862_v8 = vrot.slane %v2748_v55, 3 }
 0x272   :  { %v867_v52 = vrot.slane %v2748_v55, 4 }
 0x273   :  { %v809_v60 = vadd.f32 %v808_v57, %v780_v31 }
 0x275   :  { %v838_v63 = vadd.f32 %v837_v58, %v809_v60 }
 0x276   :  { %v753_v3 = vpop.f32.mrf.mxu1 }
 0x277   :  { %v2765_v5 = vmax.f32 %v838_v63, 0.0  ;;  %v754_v54 = vadd.f32 %v753_v3, %v725_v62  ;;  %v1605_v62 = vld [vmem:[%s3107_s2 + $0x7f8] sm:$0xff]  ;;  %v1604_v63 = vld [vmem:[%s3107_s2 + $0x7f0] sm:$0xff]  ;;  %v1603_v3 = vld [vmem:[%s3107_s2 + $0x7e8] sm:$0xff] }
 0x278   :  { %1255 = vmatpush.msra.mxu2 %v1605_v62  ;;  %v1624_v62 = vld [vmem:[%s3107_s2 + $0x890] sm:$0xff] }
 0x279   :  { %v783_v9 = vadd.f32 %v782_v2, %v754_v54  ;;  %v853_v10 = vrot.slane %v2765_v5, 1  ;;  %v858_v11 = vrot.slane %v2765_v5, 2  ;;  %v863_v12 = vrot.slane %v2765_v5, 3  ;;  %v1620_v2 = vld [vmem:[%s3107_s2 + $0x870] sm:$0xff]  ;;  %v1619_v54 = vld [vmem:[%s3107_s2 + $0x868] sm:$0xff] }
 0x27a   :  { %v868_v51 = vrot.slane %v2765_v5, 4  ;;  %1256 = vmatpush.msra.mxu2 %v1604_v63  ;;  %1279 = vmatpush.msra.mxu3 %v1620_v2  ;;  %v1640_v63 = vld [vmem:[%s3107_s2 + $0x910] sm:$0xff]  ;;  %v1623_v2 = vld [vmem:[%s3107_s2 + $0x888] sm:$0xff] }
 0x27b   :  { %v812_v4 = vadd.f32 %v811_v6, %v783_v9  ;;  %v854_v13 = vsel %vm193_vm12, %v852_v44, %v853_v10  ;;  %v859_v53 = vsel %vm202_vm14, %v857_v50, %v858_v11  ;;  %v864_v14 = vsel %vm211_vm15, %v862_v8, %v863_v12  ;;  %v1601_v6 = vld [vmem:[%s3107_s2 + $0x7d8] sm:$0xff]  ;;  %v1618_v44 = vld [vmem:[%s3107_s2 + $0x860] sm:$0xff]  ;;  %v1600_v50 = vld [vmem:[%s3107_s2 + $0x7d0] sm:$0xff] }
 0x27c   :  { %1038 = vmatmul.f32.vlgmr.msrb.gmra.mxu2 %v854_v13  ;;  %1064 = vmatmul.f32.vlgmr.msrb.gmra.mxu3 %v859_v53  ;;  %v869_v56 = vsel %vm220_vm13, %v867_v52, %v868_v51  ;;  %v1617_v8 = vld [vmem:[%s3107_s2 + $0x858] sm:$0xff]  ;;  %v1599_v9 = vld [vmem:[%s3107_s2 + $0x7c8] sm:$0xff]  ;;  %v1614_v53 = vld [vmem:[%s3107_s2 + $0x840] sm:$0xff] }
 0x27d   :  { %v841_v17 = vadd.f32 %v840_v7, %v812_v4  ;;  %1090 = vmatmul.f32.vlgmr.msrb.gmra.mxu0 %v864_v14  ;;  %1257 = vmatpush.msra.mxu2 %v1603_v3  ;;  %v1637_v7 = vld [vmem:[%s3107_s2 + $0x8f8] sm:$0xff]  ;;  %v1636_v14 = vld [vmem:[%s3107_s2 + $0x8f0] sm:$0xff]  ;;  %v1639_v3 = vld [vmem:[%s3107_s2 + $0x908] sm:$0xff] }
 0x27e   :  { %v756_v18 = vpop.f32.mrf.mxu1  ;;  %1280 = vmatpush.msra.mxu3 %v1619_v54  ;;  %v2846_v4 = vld [vmem:[%s3107_s2 + $0x978] sm:$0xff]  ;;  %1301 = vmatpush.msra.mxu0 %v1637_v7  ;;  %v2981_v52 = vld [vmem:[%s3107_s2 + $0x930] sm:$0xff]  ;;  %v1622_v54 = vld [vmem:[%s3107_s2 + $0x880] sm:$0xff] }
 0x27f   :  { %v848_v19 = vmax.f32 %v841_v17, 0.0  ;;  %v757_v20 = vadd.f32 %v756_v18, %v728_v16  ;;  %v1597_v13 = vld [vmem:[%s3107_s2 + $0x7b8] sm:$0xff]  ;;  %v2860_v16 = vld [vmem:[%s3107_s2 + $0x970] sm:$0xff]  ;;  %1324 = vmatpush.msrb.mxu1 %v2846_v4  ;;  %v1635_v18 = vld [vmem:[%s3107_s2 + $0x8e8] sm:$0xff] }
 0x280   :  { %1281 = vmatpush.msra.mxu3 %v1618_v44  ;;  %v1596_v17 = vld [vmem:[%s3107_s2 + $0x7b0] sm:$0xff]  ;;  %1302 = vmatpush.msra.mxu0 %v1636_v14  ;;  %v1638_v44 = vld [vmem:[%s3107_s2 + $0x900] sm:$0xff]  ;;  %v1659_v7 = vld [vmem:[%s3107_s2 + $0x9a8] sm:$0xff] }
 0x281   :  { %v786_v22 = vadd.f32 %v785_v21, %v757_v20  ;;  %v883_v23 = vrot.slane %v848_v19, 4  ;;  %v874_v36 = vrot.slane %v848_v19, 1  ;;  %v877_v38 = vrot.slane %v848_v19, 2  ;;  %v2875_v20 = vld [vmem:[%s3107_s2 + $0x968] sm:$0xff]  ;;  %1325 = vmatpush.msrb.mxu1 %v2860_v16 }
 0x282   :  { %v880_v30 = vrot.slane %v848_v19, 3  ;;  %1282 = vmatpush.msra.mxu3 %v1617_v8  ;;  %v1613_v19 = vld [vmem:[%s3107_s2 + $0x838] sm:$0xff]  ;;  %v1595_v21 = vld [vmem:[%s3107_s2 + $0x7a8] sm:$0xff]  ;;  %1303 = vmatpush.msra.mxu0 %v1635_v18  ;;  %v1693_v8 = vld [vmem:[%s3108_s3 + $0x2] ss:$0 sm:$0xff] }
 0x283   :  { %v815_v27 = vadd.f32 %v814_v26, %v786_v22  ;;  %v908_v28 = vsel %vm220_vm13, %v2765_v5, %v883_v23  ;;  %v1602_v5 = vld [vmem:[%s3107_s2 + $0x7e0] sm:$0xff]  ;;  %1326 = vmatpush.msrb.mxu1 %v2875_v20 }
 0x284   :  { %1015 = vmatmul.f32.gmra.mxu1 %v908_v28  ;;  %1258 = vmatpush.msra.mxu2 %v1602_v5  ;;  %v1634_v22 = vld [vmem:[%s3107_s2 + $0x8e0] sm:$0xff]  ;;  %v1611_v28 = vld [vmem:[%s3107_s2 + $0x828] sm:$0xff] }
 0x285   :  { %v844_v33 = vadd.f32 %v843_v29, %v815_v27  ;;  %v2890_v26 = vld [vmem:[%s3107_s2 + $0x960] sm:$0xff]  ;;  %1304 = vmatpush.msra.mxu0 %v1634_v22  ;;  %v1633_v29 = vld [vmem:[%s3107_s2 + $0x8d8] sm:$0xff]  ;;  %v1663_v5 = vld [vmem:[%s3107_s2 + $0x9c8] sm:$0xff] }
 0x286   :  { %1259 = vmatpush.msra.mxu2 %v1601_v6  ;;  %v1594_v27 = vld [vmem:[%s3107_s2 + $0x7a0] sm:$0xff]  ;;  %1327 = vmatpush.msrb.mxu1 %v2890_v26 }
 0x287   :  { %v849_v34 = vmax.f32 %v844_v33, 0.0  ;;  %v2906_v33 = vld [vmem:[%s3107_s2 + $0x958] sm:$0xff]  ;;  %1305 = vmatpush.msra.mxu0 %v1633_v29 }
 0x288   :  { %1260 = vmatpush.msra.mxu2 %v1600_v50  ;;  %1328 = vmatpush.msrb.mxu1 %v2906_v33  ;;  %v1662_v50 = vld [vmem:[%s3107_s2 + $0x9c0] sm:$0xff] }
 0x289   :  { %v884_v1 = vrot.slane %v849_v34, 4  ;;  %v875_v25 = vrot.slane %v849_v34, 1  ;;  %v878_v39 = vrot.slane %v849_v34, 2  ;;  %v881_v40 = vrot.slane %v849_v34, 3  ;;  %v1593_v34 = vld [vmem:[%s3107_s2 + $0x798] sm:$0xff] }
 0x28a   :  { %1261 = vmatpush.msra.mxu2 %v1599_v9  ;;  %v1661_v9 = vld [vmem:[%s3107_s2 + $0x9b8] sm:$0xff] }
 0x28b   :  { %v885_v41 = vsel %vm220_vm13, %v883_v23, %v884_v1  ;;  %v876_v42 = vsel %vm193_vm12, %v874_v36, %v875_v25  ;;  %v879_v43 = vsel %vm202_vm14, %v877_v38, %v878_v39  ;;  %v882_v45 = vsel %vm211_vm15, %v880_v30, %v881_v40  ;;  %v1612_v23 = vld [vmem:[%s3107_s2 + $0x830] sm:$0xff]  ;;  %v1610_v36 = vld [vmem:[%s3107_s2 + $0x820] sm:$0xff] }
 0x28c   :  { %1018 = vmatmul.f32.gmra.mxu1 %v885_v41  ;;  %v886_v46 = vrot.slane %v876_v42, 4  ;;  %v887_v47 = vrot.slane %v879_v43, 4  ;;  %v888_v48 = vrot.slane %v882_v45, 4  ;;  %v890_v15 = vrot.slane %v875_v25, 4  ;;  %v1632_v38 = vld [vmem:[%s3107_s2 + $0x8d0] sm:$0xff]  ;;  %v1609_v25 = vld [vmem:[%s3107_s2 + $0x818] sm:$0xff] }
 0x28d   :  { %v892_v35 = vrot.slane %v878_v39, 4  ;;  %v894_v37 = vrot.slane %v881_v40, 4  ;;  %v889_v59 = vrot.slane %v885_v41, 4  ;;  %v896_v55 = vrot.slane %v884_v1, 4  ;;  %v2921_v30 = vld [vmem:[%s3107_s2 + $0x950] sm:$0xff]  ;;  %1306 = vmatpush.msra.mxu0 %v1632_v38  ;;  %v1631_v39 = vld [vmem:[%s3107_s2 + $0x8c8] sm:$0xff] }
 0x28e   :  { %v909_v24 = vsel %vm220_vm13, %v853_v10, %v886_v46  ;;  %v910_v32 = vsel %vm220_vm13, %v858_v11, %v887_v47  ;;  %v911_v49 = vsel %vm220_vm13, %v863_v12, %v888_v48  ;;  %v891_v57 = vsel %vm220_vm13, %v886_v46, %v890_v15  ;;  %v1616_v10 = vld [vmem:[%s3107_s2 + $0x850] sm:$0xff]  ;;  %v1598_v11 = vld [vmem:[%s3107_s2 + $0x7c0] sm:$0xff]  ;;  %v1615_v12 = vld [vmem:[%s3107_s2 + $0x848] sm:$0xff]  ;;  %1329 = vmatpush.msrb.mxu1 %v2921_v30 }
 0x28f   :  { %1041 = vmatmul.f32.gmra.mxu2 %v909_v24  ;;  %1067 = vmatmul.f32.gmra.mxu3 %v910_v32  ;;  %v893_v31 = vsel %vm220_vm13, %v887_v47, %v892_v35  ;;  %v895_v58 = vsel %vm220_vm13, %v888_v48, %v894_v37  ;;  %v912_v60 = vsel %vm220_vm13, %v868_v51, %v889_v59  ;;  %v1592_v1 = vld [vmem:[%s3107_s2 + $0x790] sm:$0xff]  ;;  %v2936_v40 = vld [vmem:[%s3107_s2 + $0x948] sm:$0xff]  ;;  %v1630_v43 = vld [vmem:[%s3107_s2 + $0x8c0] sm:$0xff] }
 0x290   :  { %1093 = vmatmul.f32.gmra.mxu0 %v911_v49  ;;  %v897_v61 = vsel %vm220_vm13, %v889_v59, %v896_v55  ;;  %1283 = vmatpush.msra.mxu3 %v1616_v10  ;;  %v1591_v41 = vld [vmem:[%s3107_s2 + $0x788] sm:$0xff]  ;;  %v1608_v42 = vld [vmem:[%s3107_s2 + $0x810] sm:$0xff]  ;;  %v2950_v45 = vld [vmem:[%s3107_s2 + $0x940] sm:$0xff] }
 0x291   :  { %1262 = vmatpush.msra.mxu2 %v1598_v11  ;;  %1307 = vmatpush.msra.mxu0 %v1631_v39  ;;  %v1590_v46 = vld [vmem:[%s3107_s2 + $0x780] sm:$0xff]  ;;  %v1607_v47 = vld [vmem:[%s3107_s2 + $0x808] sm:$0xff]  ;;  %v1629_v48 = vld [vmem:[%s3107_s2 + $0x8b8] sm:$0xff] }
 0x292   :  { %1284 = vmatpush.msra.mxu3 %v1615_v12  ;;  %1330 = vmatpush.msrb.mxu1 %v2936_v40  ;;  %v2966_v24 = vld [vmem:[%s3107_s2 + $0x938] sm:$0xff]  ;;  %v1606_v49 = vld [vmem:[%s3107_s2 + $0x800] sm:$0xff]  ;;  %v1628_v51 = vld [vmem:[%s3107_s2 + $0x8b0] sm:$0xff] }
 0x293   :  { %1263 = vmatpush.msra.mxu2 %v1597_v13  ;;  %1308 = vmatpush.msra.mxu0 %v1630_v43  ;;  %v1669_v32 = vld [vmem:[%s3107_s2 + $0x9f8] sm:$0xff]  ;;  %v1668_v15 = vld [vmem:[%s3107_s2 + $0x9f0] sm:$0xff]  ;;  %v1627_v35 = vld [vmem:[%s3107_s2 + $0x8a8] sm:$0xff] }
 0x294   :  { %1116 = vmatmul.f32.vlgmr.msra.gmra.mxu1 %v869_v56  ;;  %1285 = vmatpush.msra.mxu3 %v1614_v53  ;;  %v2992_v56 = vld [vmem:[%s3107_s2 + $0x928] sm:$0xff]  ;;  %v1642_v59 = vld [vmem:[%s3107_s2 + $0x920] sm:$0xff]  ;;  %v1641_v55 = vld [vmem:[%s3107_s2 + $0x918] sm:$0xff] }
 0x295   :  { %1264 = vmatpush.msra.mxu2 %v1596_v17  ;;  %1331 = vmatpush.msrb.mxu1 %v2950_v45  ;;  %v1667_v37 = vld [vmem:[%s3107_s2 + $0x9e8] sm:$0xff]  ;;  %v1660_v12 = vld [vmem:[%s3107_s2 + $0x9b0] sm:$0xff]  ;;  %v1658_v53 = vld [vmem:[%s3107_s2 + $0x9a0] sm:$0xff] }
 0x296   :  { %1286 = vmatpush.msra.mxu3 %v1613_v19  ;;  %1309 = vmatpush.msra.mxu0 %v1629_v48  ;;  %v1656_v19 = vld [vmem:[%s3107_s2 + $0x990] sm:$0xff] }
 0x297   :  { %1044 = vmatmul.f32.gmra.mxu2 %v891_v57  ;;  %1070 = vmatmul.f32.gmra.mxu3 %v893_v31  ;;  %v1626_v57 = vld [vmem:[%s3107_s2 + $0x8a0] sm:$0xff] }
 0x298   :  { %1096 = vmatmul.f32.gmra.mxu0 %v895_v58  ;;  %1265 = vmatpush.msra.mxu2 %v1595_v21  ;;  %v1666_v58 = vld [vmem:[%s3107_s2 + $0x9e0] sm:$0xff] }
 0x299   :  { %1287 = vmatpush.msra.mxu3 %v1612_v23  ;;  %1332 = vmatpush.msrb.mxu1 %v2966_v24 }
 0x29a   :  { %1266 = vmatpush.msra.mxu2 %v1594_v27  ;;  %1310 = vmatpush.msra.mxu0 %v1628_v51 }
 0x29b   :  { %1288 = vmatpush.msra.mxu3 %v1611_v28  ;;  %1333 = vmatpush.msrb.mxu1 %v2981_v52 }
 0x29c   :  { %1119 = vmatmul.f32.gmra.mxu1 %v912_v60  ;;  %1267 = vmatpush.msra.mxu2 %v1593_v34  ;;  %v1625_v60 = vld [vmem:[%s3107_s2 + $0x898] sm:$0xff] }
 0x29d   :  { %1289 = vmatpush.msra.mxu3 %v1610_v36  ;;  %1311 = vmatpush.msra.mxu0 %v1627_v35 }
 0x29e   :  { %1268 = vmatpush.msra.mxu2 %v1592_v1  ;;  %1334 = vmatpush.msrb.mxu1 %v2992_v56 }
 0x29f   :  { %1290 = vmatpush.msra.mxu3 %v1609_v25  ;;  %1312 = vmatpush.msra.mxu0 %v1626_v57 }
 0x2a0   :  { %1269 = vmatpush.msra.mxu2 %v1591_v41  ;;  %1335 = vmatpush.msrb.mxu1 %v1642_v59 }
 0x2a1   :  { %1291 = vmatpush.msra.mxu3 %v1608_v42  ;;  %1313 = vmatpush.msra.mxu0 %v1625_v60 }
 0x2a2   :  { %1270 = vmatpush.msra.mxu2 %v1590_v46  ;;  %1336 = vmatpush.msrb.mxu1 %v1641_v55 }
 0x2a3   :  { %1292 = vmatpush.msra.mxu3 %v1607_v47  ;;  %1314 = vmatpush.msra.mxu0 %v1624_v62 }
 0x2a4   :  { %1122 = vmatmul.f32.gmra.mxu1 %v897_v61  ;;  %1347 = vmatpush.msrb.mxu2 %v1669_v32  ;;  %v1665_v61 = vld [vmem:[%s3107_s2 + $0x9d8] sm:$0xff] }
 0x2a5   :  { %1293 = vmatpush.msra.mxu3 %v1606_v49  ;;  %1337 = vmatpush.msrb.mxu1 %v1640_v63 }
 0x2a6   :  { %1348 = vmatpush.msrb.mxu2 %v1668_v15  ;;  %1315 = vmatpush.msra.mxu0 %v1623_v2 }
 0x2a7   :  { %1670 = vmatpush.msrb.mxu3 %v2846_v4  ;;  %1338 = vmatpush.msrb.mxu1 %v1639_v3 }
 0x2a8   :  { %1349 = vmatpush.msrb.mxu2 %v1667_v37  ;;  %1316 = vmatpush.msra.mxu0 %v1622_v54 }
 0x2a9   :  { %1671 = vmatpush.msrb.mxu3 %v2860_v16  ;;  %1339 = vmatpush.msrb.mxu1 %v1638_v44  ;;  %v1657_v16 = vld [vmem:[%s3107_s2 + $0x998] sm:$0xff] }
 0x2aa   :  { %1350 = vmatpush.msrb.mxu2 %v1666_v58 }
 0x2ab   :  { %1672 = vmatpush.msrb.mxu3 %v2875_v20  ;;  %v1655_v20 = vld [vmem:[%s3107_s2 + $0x988] sm:$0xff] }
 0x2ac   :  { %1351 = vmatpush.msrb.mxu2 %v1665_v61 }
 0x2ad   :  { %1673 = vmatpush.msrb.mxu3 %v2890_v26  ;;  %v1654_v26 = vld [vmem:[%s3107_s2 + $0x980] sm:$0xff] }
 0x2ae   :  { %1352 = vmatpush.msrb.mxu2 %v1664_v0 }
 0x2af   :  { %1674 = vmatpush.msrb.mxu3 %v2906_v33 }
 0x2b0   :  { %1353 = vmatpush.msrb.mxu2 %v1663_v5 }
 0x2b1   :  { %1675 = vmatpush.msrb.mxu3 %v2921_v30 }
 0x2b2   :  { %1354 = vmatpush.msrb.mxu2 %v1662_v50 }
 0x2b3   :  { %1676 = vmatpush.msrb.mxu3 %v2936_v40 }
 0x2b4   :  { %1355 = vmatpush.msrb.mxu2 %v1661_v9 }
 0x2b5   :  { %1677 = vmatpush.msrb.mxu3 %v2950_v45 }
 0x2b6   :  { %1356 = vmatpush.msrb.mxu2 %v1660_v12 }
 0x2b7   :  { %1678 = vmatpush.msrb.mxu3 %v2966_v24 }
 0x2b8   :  { %1357 = vmatpush.msrb.mxu2 %v1659_v7 }
 0x2b9   :  { %1679 = vmatpush.msrb.mxu3 %v2981_v52 }
 0x2ba   :  { %1358 = vmatpush.msrb.mxu2 %v1658_v53 }
 0x2bb   :  { %1680 = vmatpush.msrb.mxu3 %v2992_v56 }
 0x2bc   :  { %1359 = vmatpush.msrb.mxu2 %v1657_v16 }
 0x2bd   :  { %1681 = vmatpush.msrb.mxu3 %v1642_v59 }
 0x2be   :  { %1360 = vmatpush.msrb.mxu2 %v1656_v19 }
 0x2bf   :  { %1682 = vmatpush.msrb.mxu3 %v1641_v55 }
 0x2c0   :  { %1361 = vmatpush.msrb.mxu2 %v1655_v20 }
 0x2c1   :  { %1683 = vmatpush.msrb.mxu3 %v1640_v63 }
 0x2c2   :  { %1362 = vmatpush.msrb.mxu2 %v1654_v26 }
 0x2c3   :  { %1684 = vmatpush.msrb.mxu3 %v1639_v3 }
 0x2c5   :  { %1685 = vmatpush.msrb.mxu3 %v1638_v44 }
 0x2ee   :  { %v1013_v31 = vpop.f32.mrf.mxu1 }
 0x2ef   :  { %v1014_v11 = vadd.f32 %v1693_v8, %v1013_v31 }
 0x2fa   :  { %v1091_v17 = vpop.f32.mrf.mxu0 }
 0x2ff   :  { %v1039_v10 = vpop.f32.mrf.mxu2  ;;  %v1065_v14 = vpop.f32.mrf.mxu3 }
 0x300   :  { %v1040_v4 = vadd.f32 %v1039_v10, %v1014_v11 }
 0x301   :  { %v1016_v6 = vpop.f32.mrf.mxu1 }
 0x302   :  { %v1066_v18 = vadd.f32 %v1065_v14, %v1040_v4  ;;  %v1017_v22 = vadd.f32 %v1693_v8, %v1016_v6 }
 0x304   :  { %v1092_v21 = vadd.f32 %v1091_v17, %v1066_v18 }
 0x309   :  { %v1019_v13 = vpop.f32.mrf.mxu1 }
 0x30a   :  { %v1020_v1 = vadd.f32 %v1693_v8, %v1019_v13  ;;  %v1694_v13 = vld [vmem:[%s3108_s3 + $0x3] ss:$0 sm:$0xff] }
 0x30d   :  { %v1094_v34 = vpop.f32.mrf.mxu0 }
 0x311   :  { %v1117_v23 = vpop.f32.mrf.mxu1 }
 0x312   :  { %v1118_v27 = vadd.f32 %v1117_v23, %v1092_v21  ;;  %v1042_v28 = vpop.f32.mrf.mxu2  ;;  %v1068_v29 = vpop.f32.mrf.mxu3 }
 0x313   :  { %v1043_v33 = vadd.f32 %v1042_v28, %v1017_v22  ;;  %v11_v22 = vstv %s3110_s5 }
 0x314   :  { %v1126_v36 = vmax.f32 %v1118_v27, 0.0  ;;  %12 = vst [vmem:[#allocation2] sm:$0x1] %v11_v22 }
 0x315   :  { %v1069_v38 = vadd.f32 %v1068_v29, %v1043_v33  ;;  %v1097_v48 = vpop.f32.mrf.mxu0 }
 0x316   :  { %1271 = vmatmul.f32.vlgmr.msra.gmra.mxu2 %v1126_v36  ;;  %v1131_v46 = vrot.slane %v1126_v36, 1  ;;  %v1135_v47 = vrot.slane %v1126_v36, 2  ;;  %v1139_v49 = vrot.slane %v1126_v36, 3  ;;  %v1143_v8 = vrot.slane %v1126_v36, 4 }
 0x317   :  { %v1095_v30 = vadd.f32 %v1094_v34, %v1069_v38 }
 0x319   :  { %v1120_v25 = vpop.f32.mrf.mxu1 }
 0x31a   :  { %v1121_v39 = vadd.f32 %v1120_v25, %v1095_v30  ;;  %v1045_v40 = vpop.f32.mrf.mxu2  ;;  %v1071_v43 = vpop.f32.mrf.mxu3 }
 0x31b   :  { %v1046_v41 = vadd.f32 %v1045_v40, %v1020_v1 }
 0x31c   :  { %v1127_v42 = vmax.f32 %v1121_v39, 0.0 }
 0x31d   :  { %v1072_v45 = vadd.f32 %v1071_v43, %v1046_v41 }
 0x31e   :  { %v1132_v24 = vrot.slane %v1127_v42, 1  ;;  %v1136_v32 = vrot.slane %v1127_v42, 2  ;;  %v1140_v51 = vrot.slane %v1127_v42, 3  ;;  %v1144_v59 = vrot.slane %v1127_v42, 4 }
 0x31f   :  { %v1098_v52 = vadd.f32 %v1097_v48, %v1072_v45 }
 0x320   :  { %v1133_v15 = vsel %vm193_vm12, %v1131_v46, %v1132_v24  ;;  %v1137_v35 = vsel %vm202_vm14, %v1135_v47, %v1136_v32  ;;  %v1141_v56 = vsel %vm211_vm15, %v1139_v49, %v1140_v51  ;;  %v1145_v11 = vsel %vm220_vm13, %v1143_v8, %v1144_v59  ;;  %v1695_v49 = vld [vmem:[%s3109_s4] ss:$0 sm:$0xff] }
 0x321   :  { %v1123_v37 = vpop.f32.mrf.mxu1  ;;  %1294 = vmatmul.f32.vlgmr.msra.gmra.mxu3 %v1133_v15  ;;  %1317 = vmatmul.f32.vlgmr.msra.gmra.mxu0 %v1137_v35 }
 0x322   :  { %v1124_v57 = vadd.f32 %v1123_v37, %v1098_v52  ;;  %1340 = vmatmul.f32.vlgmr.msrb.gmra.mxu1 %v1141_v56  ;;  %v1696_v37 = vld [vmem:[#allocation2] ss:$0 sm:$0xff] }
 0x324   :  { %v1128_v31 = vmax.f32 %v1124_v57, 0.0 }
 0x326   :  { %v1154_v58 = vrot.slane %v1128_v31, 4  ;;  %v1148_v60 = vrot.slane %v1128_v31, 1  ;;  %v1150_v55 = vrot.slane %v1128_v31, 2  ;;  %v1152_v61 = vrot.slane %v1128_v31, 3 }
 0x328   :  { %v1155_v62 = vsel %vm220_vm13, %v1144_v59, %v1154_v58  ;;  %v1149_v63 = vsel %vm193_vm12, %v1132_v24, %v1148_v60  ;;  %v1157_v0 = vrot.slane %v1148_v60, 4  ;;  %v1151_v2 = vsel %vm202_vm14, %v1136_v32, %v1150_v55 }
 0x329   :  { %1274 = vmatmul.f32.gmra.mxu2 %v1155_v62  ;;  %v1156_v3 = vrot.slane %v1149_v63, 4  ;;  %v1159_v5 = vrot.slane %v1151_v2, 4  ;;  %v1160_v54 = vrot.slane %v1150_v55, 4  ;;  %v1153_v50 = vsel %vm211_vm15, %v1140_v51, %v1152_v61 }
 0x32a   :  { %v1162_v9 = vrot.slane %v1153_v50, 4  ;;  %v1163_v10 = vrot.slane %v1152_v61, 4  ;;  %v1165_v7 = vrot.slane %v1154_v58, 4 }
 0x32b   :  { %v1158_v6 = vsel %vm220_vm13, %v1156_v3, %v1157_v0  ;;  %v1161_v44 = vsel %vm220_vm13, %v1159_v5, %v1160_v54 }
 0x32c   :  { %1297 = vmatmul.f32.gmra.mxu3 %v1158_v6  ;;  %1320 = vmatmul.f32.gmra.mxu0 %v1161_v44  ;;  %v1164_v12 = vsel %vm220_vm13, %v1162_v9, %v1163_v10 }
 0x331   :  { %1363 = vmatmul.f32.vlgmr.msrb.gmra.mxu2 %v1145_v11 }
 0x334   :  { %1343 = vmatmul.f32.vlgmr.msrb.gmra.mxu3 %v1164_v12 }
 0x339   :  { %1366 = vmatmul.f32.gmra.mxu2 %v1165_v7 }
 0x399   :  { %v1272_v4 = vpop.f32.mrf.mxu2 }
 0x39a   :  { %v1273_v14 = vadd.f32 %v1694_v13, %v1272_v4 }
 0x39e   :  { %v1318_v18 = vpop.f32.mrf.mxu0 }
 0x39f   :  { %v1341_v23 = vpop.f32.mrf.mxu1 }
 0x3a4   :  { %v1295_v53 = vpop.f32.mrf.mxu3 }
 0x3a5   :  { %v1296_v16 = vadd.f32 %v1295_v53, %v1273_v14 }
 0x3a7   :  { %v1319_v19 = vadd.f32 %v1318_v18, %v1296_v16 }
 0x3a9   :  { %v1342_v26 = vadd.f32 %v1341_v23, %v1319_v19  ;;  %v1321_v34 = vpop.f32.mrf.mxu0 }
 0x3ac   :  { %v1275_v17 = vpop.f32.mrf.mxu2 }
 0x3ad   :  { %v1276_v21 = vadd.f32 %v1694_v13, %v1275_v17 }
 0x3af   :  { %v1298_v20 = vpop.f32.mrf.mxu3 }
 0x3b0   :  { %v1299_v28 = vadd.f32 %v1298_v20, %v1276_v21 }
 0x3b2   :  { %v1322_v30 = vadd.f32 %v1321_v34, %v1299_v28 }
 0x3b4   :  { %v1364_v27 = vpop.f32.mrf.mxu2 }
 0x3b5   :  { %v1365_v29 = vadd.f32 %v1364_v27, %v1342_v26 }
 0x3b7   :  { %v1370_v33 = vmax.f32 %v1365_v29, 0.0  ;;  %v1344_v36 = vpop.f32.mrf.mxu3 }
 0x3b8   :  { %v1345_v25 = vadd.f32 %v1344_v36, %v1322_v30 }
 0x3b9   :  { %v1372_v38 = vrot.slane %v1370_v33, 4 }
 0x3bb   :  { %v1373_v1 = vadd.f32 %v1372_v38, %v1370_v33 }
 0x3bc   :  { %v1367_v39 = vpop.f32.mrf.mxu2 }
 0x3bd   :  { %v1368_v40 = vadd.f32 %v1367_v39, %v1345_v25  ;;  %v1374_v41 = vrot.slane %v1373_v1, 2 }
 0x3bf   :  { %v1371_v42 = vmax.f32 %v1368_v40, 0.0  ;;  %v1375_v45 = vadd.f32 %v1374_v41, %v1373_v1 }
 0x3c1   :  { %v1378_v43 = vrot.slane %v1371_v42, 4  ;;  %v1376_v48 = vrot.slane %v1375_v45, 1 }
 0x3c3   :  { %v1379_v46 = vadd.f32 %v1378_v43, %v1371_v42  ;;  %v1377_v51 = vadd.f32 %v1376_v48, %v1375_v45 }
 0x3c5   :  { %v1380_v47 = vrot.slane %v1379_v46, 2 }
 0x3c7   :  { %v1381_v24 = vadd.f32 %v1380_v47, %v1379_v46 }
 0x3c9   :  { %v1382_v32 = vrot.slane %v1381_v24, 1 }
 0x3cb   :  { %v1383_v52 = vadd.f32 %v1382_v32, %v1381_v24 }
 0x3cd   :  { %v1385_v15 = vsel %vm1384_vm0, %v1377_v51, %v1383_v52 }
 0x3ce   :  { %v1390_v35 = vmul.f32 %v1695_v49, %v1385_v15 }
 0x3d0   :  { %v1392_v56 = vsel %vm1391_vm1, %v1390_v35, 0.0 }
 0x3d1   :  { %1393 = vadd.xlane.f32.xlu0 %v1392_v56 }
 0x444   :  { %v1394_v57 = vpop.xlane.xlu0 %1393 }
 0x445   :  { %v1399_v31 = vadd.f32 %v1696_v37, %v1394_v57 }
 0x447   :  { %1401 = vst.msk [vmem:[%s3111_s6] sm:$0x3] %vm1400_vm2, %v1399_v31 }

</bundles_post_ra>
